<compile_context>
chip_gen: v5e
topology: v5e:2x2
jax: 0.10.0
libtpu: 0.0.40
codegen_flags: <defaults>
</compile_context>

<pallas_src>
import jax
import jax.numpy as jnp
from jax import lax
from jax.experimental import pallas as pl
from jax.experimental.pallas import tpu as pltpu


def _mf_kernel(u_ids_ref, v_ids_ref, user_t_ref, item_t_ref, o_ref):
    """One batch tile of 8*TB rows.

    u_ids_ref, v_ids_ref : (8, TB) int32    -- indices for this batch tile.
    user_t_ref           : (E, num_users)   -- transposed user table (VMEM, single-buffered).
    item_t_ref           : (E, num_items)   -- transposed item table (VMEM, single-buffered).
    o_ref                : (8, TB) float32  -- lane-dense per-row dot products.
    """
    tb = u_ids_ref.shape[1]
    nu = user_t_ref.shape[1]
    ni = item_t_ref.shape[1]

    user_t = user_t_ref[...]                                   # (E, nu)
    item_t = item_t_ref[...]                                   # (E, ni)
    u_ids = u_ids_ref[...]                                     # (8, TB)
    v_ids = v_ids_ref[...]                                     # (8, TB)

    # Row-index iotas, hoisted out of the sub-row loop (built once per step).
    iota_u = lax.broadcasted_iota(jnp.int32, (nu, tb), 0)      # (nu, TB)
    iota_v = lax.broadcasted_iota(jnp.int32, (ni, tb), 0)      # (ni, TB)

    rows = []
    # Static unroll over the 8 sublane rows of this tile: each sub-row does an
    # exact one-hot gather (MXU) of TB user/item embedding rows, keeping the
    # batch on the lane axis, then a VPU multiply + sublane (XLU) reduce.
    for r in range(8):
        u_oh = (iota_u == u_ids[r][None, :]).astype(user_t.dtype)   # (nu, TB)
        v_oh = (iota_v == v_ids[r][None, :]).astype(item_t.dtype)   # (ni, TB)
        u_rows = jnp.dot(user_t, u_oh,
                         preferred_element_type=jnp.float32)        # (E, TB)
        v_rows = jnp.dot(item_t, v_oh,
                         preferred_element_type=jnp.float32)        # (E, TB)
        rows.append(jnp.sum(u_rows * v_rows, axis=0))               # (TB,)

    # Single unmasked, lane-dense full-tile store.
    o_ref[...] = jnp.stack(rows, axis=0)                            # (8, TB)


def mf_prepare_tables(user_emb, item_emb):
    """Transpose the (N, E) embedding tables to (E, N) once (cache the result).

    Doing this per forward call would re-materialize both tables in HBM every
    time; callers should hold on to the transposed copies.
    """
    return user_emb.T, item_emb.T


def _choose_tiling(B):
    """Pick TB in {128, 256, 512} minimizing padding; prefer >=2 grid steps."""
    best = None
    for tb in (128, 256, 512):
        step = 8 * tb
        nt = max(1, -(-B // step))
        b_pad = nt * step
        key = (b_pad, 0 if nt >= 2 else 1, step)
        if best is None or key < best[0]:
            best = (key, tb, nt, b_pad)
    _, tb, nt, b_pad = best
    return tb, nt, b_pad


def mf_forward(u_ids, v_ids, user_t, item_t):
    """Equivalent of MF.forward(u, v): (user_emb[u] * item_emb[v]).sum(-1).

    user_t / item_t are the pre-transposed (E, N) tables from mf_prepare_tables.
    """
    B = u_ids.shape[0]
    E, NU = user_t.shape
    _, NI = item_t.shape

    TB, nt, B_pad = _choose_tiling(B)
    pad = B_pad - B
    u_p = jnp.pad(u_ids.astype(jnp.int32), (0, pad)).reshape(nt * 8, TB)
    v_p = jnp.pad(v_ids.astype(jnp.int32), (0, pad)).reshape(nt * 8, TB)

    # VMEM budget: tables once (Buffered(1)), double-buffered ID/output tiles,
    # per-sub-row one-hot + gathered (E, TB) intermediates, plus headroom.
    table_bytes = 4 * E * (NU + NI)
    io_bytes = 2 * 3 * (8 * TB) * 4
    inter_bytes = 4 * TB * (NU + NI + 4 * E)
    vmem_limit = int(min(table_bytes + io_bytes + 8 * inter_bytes + (8 << 20),
                         64 << 20))

    # TODO(synk): above this ceiling, switch to the HBM (pl.ANY) + manual
    # double-buffered DMA-gather path instead of VMEM-resident tables.
    if table_bytes > (40 << 20):
        raise NotImplementedError(
            "embedding tables too large for the VMEM-resident MF kernel")

    out = pl.pallas_call(
        _mf_kernel,
        out_shape=jax.ShapeDtypeStruct((nt * 8, TB), jnp.float32),
        grid=(nt,),
        in_specs=[
            pl.BlockSpec((8, TB), lambda i: (i, 0)),
            pl.BlockSpec((8, TB), lambda i: (i, 0)),
            # Full tables, constant block index -> VMEM resident across the
            # grid; Buffered(1) avoids double-buffering them.
            pl.BlockSpec((E, NU), lambda i: (0, 0),
                         pipeline_mode=pl.Buffered(1)),
            pl.BlockSpec((E, NI), lambda i: (0, 0),
                         pipeline_mode=pl.Buffered(1)),
        ],
        out_specs=pl.BlockSpec((8, TB), lambda i: (i, 0)),
        compiler_params=pltpu.CompilerParams(
            dimension_semantics=("parallel",),
            vmem_limit_bytes=vmem_limit,
        ),
    )(u_p, v_p, user_t, item_t)

    return out.reshape(B_pad)[:B]


if __name__ == "__main__":
    # Small shapes consistent with the module; emb_size picked as 128 so the
    # embedding rows are lane-dense on TPU (torch default is 100).
    num_users, num_items, emb_size = 32, 48, 128
    batch = 8

    key = jax.random.PRNGKey(0)
    k_ue, k_ie, k_u, k_v = jax.random.split(key, 4)

    # Deterministic param init, matching weight.data.uniform_(0, 0.5).
    user_emb = jax.random.uniform(
        k_ue, (num_users, emb_size), dtype=jnp.float32, minval=0.0, maxval=0.5)
    item_emb = jax.random.uniform(
        k_ie, (num_items, emb_size), dtype=jnp.float32, minval=0.0, maxval=0.5)

    u_ids = jax.random.randint(k_u, (batch,), 0, num_users, dtype=jnp.int32)
    v_ids = jax.random.randint(k_v, (batch,), 0, num_items, dtype=jnp.int32)

    # Transpose once, outside the forward path (cached "parameters").
    user_t, item_t = mf_prepare_tables(user_emb, item_emb)

    out = mf_forward(u_ids, v_ids, user_t, item_t)
    out = jax.block_until_ready(out)

    # Pure-JAX reference check of the forward semantics. The one-hot gather is
    # mathematically exact; a small margin is left for MXU f32 pass rounding.
    ref = jnp.sum(user_emb[u_ids] * item_emb[v_ids], axis=1)
    assert out.shape == (batch,) and out.dtype == jnp.float32
    assert jnp.allclose(out, ref, rtol=5e-3, atol=5e-3), (out, ref)

    print("KERNEL_OK")
</pallas_src>

<mosaic_0001>
module attributes {stable_mosaic.version = 11 : i64} {
  func.func @_mf_kernel(%arg0: i32, %arg1: memref<8x128xi32, #tpu.memory_space<vmem>>, %arg2: memref<8x128xi32, #tpu.memory_space<vmem>>, %arg3: memref<128x32xf32, #tpu.memory_space<vmem>>, %arg4: memref<128x48xf32, #tpu.memory_space<vmem>>, %arg5: memref<8x128xf32, #tpu.memory_space<vmem>>) attributes {dimension_semantics = [#tpu.dimension_semantics<parallel>], iteration_bounds = array<i64: 1>, scalar_prefetch = 0 : i64, scratch_operands = 0 : i64, tpu.core_type = #tpu.core_type<tc>, window_params = [{transform_indices = @transform_0, window_bounds = array<i64: 8, 128>}, {transform_indices = @transform_1, window_bounds = array<i64: 8, 128>}, {pipeline_mode = #tpu.pipeline_mode<synchronous>, transform_indices = @transform_2, window_bounds = array<i64: 128, 32>}, {pipeline_mode = #tpu.pipeline_mode<synchronous>, transform_indices = @transform_3, window_bounds = array<i64: 128, 48>}, {transform_indices = @transform_4, window_bounds = array<i64: 8, 128>}]} {
    %c0 = arith.constant 0 : index
    %c0_0 = arith.constant 0 : index
    %0 = vector.load %arg3[%c0, %c0_0] : memref<128x32xf32, #tpu.memory_space<vmem>>, vector<128x32xf32>
    %c0_1 = arith.constant 0 : index
    %c0_2 = arith.constant 0 : index
    %1 = vector.load %arg4[%c0_1, %c0_2] : memref<128x48xf32, #tpu.memory_space<vmem>>, vector<128x48xf32>
    %c0_3 = arith.constant 0 : index
    %c0_4 = arith.constant 0 : index
    %2 = vector.load %arg1[%c0_3, %c0_4] : memref<8x128xi32, #tpu.memory_space<vmem>>, vector<8x128xi32>
    %c0_5 = arith.constant 0 : index
    %c0_6 = arith.constant 0 : index
    %3 = vector.load %arg2[%c0_5, %c0_6] : memref<8x128xi32, #tpu.memory_space<vmem>>, vector<8x128xi32>
    %4 = tpu.iota {dimensions = array<i32: 0>} : vector<32x128xi32>
    %5 = tpu.iota {dimensions = array<i32: 0>} : vector<48x128xi32>
    %6 = vector.extract_strided_slice %2 {offsets = [0, 0], sizes = [1, 128], strides = [1, 1]} : vector<8x128xi32> to vector<1x128xi32>
    %7 = vector.shape_cast %6 : vector<1x128xi32> to vector<128xi32>
    %8 = vector.shape_cast %7 : vector<128xi32> to vector<1x128xi32>
    %9 = vector.broadcast %8 : vector<1x128xi32> to vector<32x128xi32>
    %10 = arith.cmpi eq, %4, %9 : vector<32x128xi32>
    %11 = arith.extui %10 : vector<32x128xi1> to vector<32x128xi32>
    %12 = arith.sitofp %11 : vector<32x128xi32> to vector<32x128xf32>
    %13 = vector.extract_strided_slice %3 {offsets = [0, 0], sizes = [1, 128], strides = [1, 1]} : vector<8x128xi32> to vector<1x128xi32>
    %14 = vector.shape_cast %13 : vector<1x128xi32> to vector<128xi32>
    %15 = vector.shape_cast %14 : vector<128xi32> to vector<1x128xi32>
    %16 = vector.broadcast %15 : vector<1x128xi32> to vector<48x128xi32>
    %17 = arith.cmpi eq, %5, %16 : vector<48x128xi32>
    %18 = arith.extui %17 : vector<48x128xi1> to vector<48x128xi32>
    %19 = arith.sitofp %18 : vector<48x128xi32> to vector<48x128xf32>
    %cst = arith.constant dense<0.000000e+00> : vector<128x128xf32>
    %20 = tpu.matmul %0, %12, %cst {dimension_numbers = #tpu.dot_dimension_numbers<[1], [0], [0], [1], [0, 0, 1, 1], [], []>} : vector<128x32xf32>, vector<32x128xf32>, vector<128x128xf32> -> vector<128x128xf32>
    %cst_7 = arith.constant dense<0.000000e+00> : vector<128x128xf32>
    %21 = tpu.matmul %1, %19, %cst_7 {dimension_numbers = #tpu.dot_dimension_numbers<[1], [0], [0], [1], [0, 0, 1, 1], [], []>} : vector<128x48xf32>, vector<48x128xf32>, vector<128x128xf32> -> vector<128x128xf32>
    %22 = arith.mulf %20, %21 : vector<128x128xf32>
    %cst_8 = arith.constant dense<0.000000e+00> : vector<128xf32>
    %23 = vector.multi_reduction <add>, %22, %cst_8 [0] : vector<128x128xf32> to vector<128xf32>
    %24 = vector.extract_strided_slice %2 {offsets = [1, 0], sizes = [1, 128], strides = [1, 1]} : vector<8x128xi32> to vector<1x128xi32>
    %25 = vector.shape_cast %24 : vector<1x128xi32> to vector<128xi32>
    %26 = vector.shape_cast %25 : vector<128xi32> to vector<1x128xi32>
    %27 = vector.broadcast %26 : vector<1x128xi32> to vector<32x128xi32>
    %28 = arith.cmpi eq, %4, %27 : vector<32x128xi32>
    %29 = arith.extui %28 : vector<32x128xi1> to vector<32x128xi32>
    %30 = arith.sitofp %29 : vector<32x128xi32> to vector<32x128xf32>
    %31 = vector.extract_strided_slice %3 {offsets = [1, 0], sizes = [1, 128], strides = [1, 1]} : vector<8x128xi32> to vector<1x128xi32>
    %32 = vector.shape_cast %31 : vector<1x128xi32> to vector<128xi32>
    %33 = vector.shape_cast %32 : vector<128xi32> to vector<1x128xi32>
    %34 = vector.broadcast %33 : vector<1x128xi32> to vector<48x128xi32>
    %35 = arith.cmpi eq, %5, %34 : vector<48x128xi32>
    %36 = arith.extui %35 : vector<48x128xi1> to vector<48x128xi32>
    %37 = arith.sitofp %36 : vector<48x128xi32> to vector<48x128xf32>
    %cst_9 = arith.constant dense<0.000000e+00> : vector<128x128xf32>
    %38 = tpu.matmul %0, %30, %cst_9 {dimension_numbers = #tpu.dot_dimension_numbers<[1], [0], [0], [1], [0, 0, 1, 1], [], []>} : vector<128x32xf32>, vector<32x128xf32>, vector<128x128xf32> -> vector<128x128xf32>
    %cst_10 = arith.constant dense<0.000000e+00> : vector<128x128xf32>
    %39 = tpu.matmul %1, %37, %cst_10 {dimension_numbers = #tpu.dot_dimension_numbers<[1], [0], [0], [1], [0, 0, 1, 1], [], []>} : vector<128x48xf32>, vector<48x128xf32>, vector<128x128xf32> -> vector<128x128xf32>
    %40 = arith.mulf %38, %39 : vector<128x128xf32>
    %cst_11 = arith.constant dense<0.000000e+00> : vector<128xf32>
    %41 = vector.multi_reduction <add>, %40, %cst_11 [0] : vector<128x128xf32> to vector<128xf32>
    %42 = vector.extract_strided_slice %2 {offsets = [2, 0], sizes = [1, 128], strides = [1, 1]} : vector<8x128xi32> to vector<1x128xi32>
    %43 = vector.shape_cast %42 : vector<1x128xi32> to vector<128xi32>
    %44 = vector.shape_cast %43 : vector<128xi32> to vector<1x128xi32>
    %45 = vector.broadcast %44 : vector<1x128xi32> to vector<32x128xi32>
    %46 = arith.cmpi eq, %4, %45 : vector<32x128xi32>
    %47 = arith.extui %46 : vector<32x128xi1> to vector<32x128xi32>
    %48 = arith.sitofp %47 : vector<32x128xi32> to vector<32x128xf32>
    %49 = vector.extract_strided_slice %3 {offsets = [2, 0], sizes = [1, 128], strides = [1, 1]} : vector<8x128xi32> to vector<1x128xi32>
    %50 = vector.shape_cast %49 : vector<1x128xi32> to vector<128xi32>
    %51 = vector.shape_cast %50 : vector<128xi32> to vector<1x128xi32>
    %52 = vector.broadcast %51 : vector<1x128xi32> to vector<48x128xi32>
    %53 = arith.cmpi eq, %5, %52 : vector<48x128xi32>
    %54 = arith.extui %53 : vector<48x128xi1> to vector<48x128xi32>
    %55 = arith.sitofp %54 : vector<48x128xi32> to vector<48x128xf32>
    %cst_12 = arith.constant dense<0.000000e+00> : vector<128x128xf32>
    %56 = tpu.matmul %0, %48, %cst_12 {dimension_numbers = #tpu.dot_dimension_numbers<[1], [0], [0], [1], [0, 0, 1, 1], [], []>} : vector<128x32xf32>, vector<32x128xf32>, vector<128x128xf32> -> vector<128x128xf32>
    %cst_13 = arith.constant dense<0.000000e+00> : vector<128x128xf32>
    %57 = tpu.matmul %1, %55, %cst_13 {dimension_numbers = #tpu.dot_dimension_numbers<[1], [0], [0], [1], [0, 0, 1, 1], [], []>} : vector<128x48xf32>, vector<48x128xf32>, vector<128x128xf32> -> vector<128x128xf32>
    %58 = arith.mulf %56, %57 : vector<128x128xf32>
    %cst_14 = arith.constant dense<0.000000e+00> : vector<128xf32>
    %59 = vector.multi_reduction <add>, %58, %cst_14 [0] : vector<128x128xf32> to vector<128xf32>
    %60 = vector.extract_strided_slice %2 {offsets = [3, 0], sizes = [1, 128], strides = [1, 1]} : vector<8x128xi32> to vector<1x128xi32>
    %61 = vector.shape_cast %60 : vector<1x128xi32> to vector<128xi32>
    %62 = vector.shape_cast %61 : vector<128xi32> to vector<1x128xi32>
    %63 = vector.broadcast %62 : vector<1x128xi32> to vector<32x128xi32>
    %64 = arith.cmpi eq, %4, %63 : vector<32x128xi32>
    %65 = arith.extui %64 : vector<32x128xi1> to vector<32x128xi32>
    %66 = arith.sitofp %65 : vector<32x128xi32> to vector<32x128xf32>
    %67 = vector.extract_strided_slice %3 {offsets = [3, 0], sizes = [1, 128], strides = [1, 1]} : vector<8x128xi32> to vector<1x128xi32>
    %68 = vector.shape_cast %67 : vector<1x128xi32> to vector<128xi32>
    %69 = vector.shape_cast %68 : vector<128xi32> to vector<1x128xi32>
    %70 = vector.broadcast %69 : vector<1x128xi32> to vector<48x128xi32>
    %71 = arith.cmpi eq, %5, %70 : vector<48x128xi32>
    %72 = arith.extui %71 : vector<48x128xi1> to vector<48x128xi32>
    %73 = arith.sitofp %72 : vector<48x128xi32> to vector<48x128xf32>
    %cst_15 = arith.constant dense<0.000000e+00> : vector<128x128xf32>
    %74 = tpu.matmul %0, %66, %cst_15 {dimension_numbers = #tpu.dot_dimension_numbers<[1], [0], [0], [1], [0, 0, 1, 1], [], []>} : vector<128x32xf32>, vector<32x128xf32>, vector<128x128xf32> -> vector<128x128xf32>
    %cst_16 = arith.constant dense<0.000000e+00> : vector<128x128xf32>
    %75 = tpu.matmul %1, %73, %cst_16 {dimension_numbers = #tpu.dot_dimension_numbers<[1], [0], [0], [1], [0, 0, 1, 1], [], []>} : vector<128x48xf32>, vector<48x128xf32>, vector<128x128xf32> -> vector<128x128xf32>
    %76 = arith.mulf %74, %75 : vector<128x128xf32>
    %cst_17 = arith.constant dense<0.000000e+00> : vector<128xf32>
    %77 = vector.multi_reduction <add>, %76, %cst_17 [0] : vector<128x128xf32> to vector<128xf32>
    %78 = vector.extract_strided_slice %2 {offsets = [4, 0], sizes = [1, 128], strides = [1, 1]} : vector<8x128xi32> to vector<1x128xi32>
    %79 = vector.shape_cast %78 : vector<1x128xi32> to vector<128xi32>
    %80 = vector.shape_cast %79 : vector<128xi32> to vector<1x128xi32>
    %81 = vector.broadcast %80 : vector<1x128xi32> to vector<32x128xi32>
    %82 = arith.cmpi eq, %4, %81 : vector<32x128xi32>
    %83 = arith.extui %82 : vector<32x128xi1> to vector<32x128xi32>
    %84 = arith.sitofp %83 : vector<32x128xi32> to vector<32x128xf32>
    %85 = vector.extract_strided_slice %3 {offsets = [4, 0], sizes = [1, 128], strides = [1, 1]} : vector<8x128xi32> to vector<1x128xi32>
    %86 = vector.shape_cast %85 : vector<1x128xi32> to vector<128xi32>
    %87 = vector.shape_cast %86 : vector<128xi32> to vector<1x128xi32>
    %88 = vector.broadcast %87 : vector<1x128xi32> to vector<48x128xi32>
    %89 = arith.cmpi eq, %5, %88 : vector<48x128xi32>
    %90 = arith.extui %89 : vector<48x128xi1> to vector<48x128xi32>
    %91 = arith.sitofp %90 : vector<48x128xi32> to vector<48x128xf32>
    %cst_18 = arith.constant dense<0.000000e+00> : vector<128x128xf32>
    %92 = tpu.matmul %0, %84, %cst_18 {dimension_numbers = #tpu.dot_dimension_numbers<[1], [0], [0], [1], [0, 0, 1, 1], [], []>} : vector<128x32xf32>, vector<32x128xf32>, vector<128x128xf32> -> vector<128x128xf32>
    %cst_19 = arith.constant dense<0.000000e+00> : vector<128x128xf32>
    %93 = tpu.matmul %1, %91, %cst_19 {dimension_numbers = #tpu.dot_dimension_numbers<[1], [0], [0], [1], [0, 0, 1, 1], [], []>} : vector<128x48xf32>, vector<48x128xf32>, vector<128x128xf32> -> vector<128x128xf32>
    %94 = arith.mulf %92, %93 : vector<128x128xf32>
    %cst_20 = arith.constant dense<0.000000e+00> : vector<128xf32>
    %95 = vector.multi_reduction <add>, %94, %cst_20 [0] : vector<128x128xf32> to vector<128xf32>
    %96 = vector.extract_strided_slice %2 {offsets = [5, 0], sizes = [1, 128], strides = [1, 1]} : vector<8x128xi32> to vector<1x128xi32>
    %97 = vector.shape_cast %96 : vector<1x128xi32> to vector<128xi32>
    %98 = vector.shape_cast %97 : vector<128xi32> to vector<1x128xi32>
    %99 = vector.broadcast %98 : vector<1x128xi32> to vector<32x128xi32>
    %100 = arith.cmpi eq, %4, %99 : vector<32x128xi32>
    %101 = arith.extui %100 : vector<32x128xi1> to vector<32x128xi32>
    %102 = arith.sitofp %101 : vector<32x128xi32> to vector<32x128xf32>
    %103 = vector.extract_strided_slice %3 {offsets = [5, 0], sizes = [1, 128], strides = [1, 1]} : vector<8x128xi32> to vector<1x128xi32>
    %104 = vector.shape_cast %103 : vector<1x128xi32> to vector<128xi32>
    %105 = vector.shape_cast %104 : vector<128xi32> to vector<1x128xi32>
    %106 = vector.broadcast %105 : vector<1x128xi32> to vector<48x128xi32>
    %107 = arith.cmpi eq, %5, %106 : vector<48x128xi32>
    %108 = arith.extui %107 : vector<48x128xi1> to vector<48x128xi32>
    %109 = arith.sitofp %108 : vector<48x128xi32> to vector<48x128xf32>
    %cst_21 = arith.constant dense<0.000000e+00> : vector<128x128xf32>
    %110 = tpu.matmul %0, %102, %cst_21 {dimension_numbers = #tpu.dot_dimension_numbers<[1], [0], [0], [1], [0, 0, 1, 1], [], []>} : vector<128x32xf32>, vector<32x128xf32>, vector<128x128xf32> -> vector<128x128xf32>
    %cst_22 = arith.constant dense<0.000000e+00> : vector<128x128xf32>
    %111 = tpu.matmul %1, %109, %cst_22 {dimension_numbers = #tpu.dot_dimension_numbers<[1], [0], [0], [1], [0, 0, 1, 1], [], []>} : vector<128x48xf32>, vector<48x128xf32>, vector<128x128xf32> -> vector<128x128xf32>
    %112 = arith.mulf %110, %111 : vector<128x128xf32>
    %cst_23 = arith.constant dense<0.000000e+00> : vector<128xf32>
    %113 = vector.multi_reduction <add>, %112, %cst_23 [0] : vector<128x128xf32> to vector<128xf32>
    %114 = vector.extract_strided_slice %2 {offsets = [6, 0], sizes = [1, 128], strides = [1, 1]} : vector<8x128xi32> to vector<1x128xi32>
    %115 = vector.shape_cast %114 : vector<1x128xi32> to vector<128xi32>
    %116 = vector.shape_cast %115 : vector<128xi32> to vector<1x128xi32>
    %117 = vector.broadcast %116 : vector<1x128xi32> to vector<32x128xi32>
    %118 = arith.cmpi eq, %4, %117 : vector<32x128xi32>
    %119 = arith.extui %118 : vector<32x128xi1> to vector<32x128xi32>
    %120 = arith.sitofp %119 : vector<32x128xi32> to vector<32x128xf32>
    %121 = vector.extract_strided_slice %3 {offsets = [6, 0], sizes = [1, 128], strides = [1, 1]} : vector<8x128xi32> to vector<1x128xi32>
    %122 = vector.shape_cast %121 : vector<1x128xi32> to vector<128xi32>
    %123 = vector.shape_cast %122 : vector<128xi32> to vector<1x128xi32>
    %124 = vector.broadcast %123 : vector<1x128xi32> to vector<48x128xi32>
    %125 = arith.cmpi eq, %5, %124 : vector<48x128xi32>
    %126 = arith.extui %125 : vector<48x128xi1> to vector<48x128xi32>
    %127 = arith.sitofp %126 : vector<48x128xi32> to vector<48x128xf32>
    %cst_24 = arith.constant dense<0.000000e+00> : vector<128x128xf32>
    %128 = tpu.matmul %0, %120, %cst_24 {dimension_numbers = #tpu.dot_dimension_numbers<[1], [0], [0], [1], [0, 0, 1, 1], [], []>} : vector<128x32xf32>, vector<32x128xf32>, vector<128x128xf32> -> vector<128x128xf32>
    %cst_25 = arith.constant dense<0.000000e+00> : vector<128x128xf32>
    %129 = tpu.matmul %1, %127, %cst_25 {dimension_numbers = #tpu.dot_dimension_numbers<[1], [0], [0], [1], [0, 0, 1, 1], [], []>} : vector<128x48xf32>, vector<48x128xf32>, vector<128x128xf32> -> vector<128x128xf32>
    %130 = arith.mulf %128, %129 : vector<128x128xf32>
    %cst_26 = arith.constant dense<0.000000e+00> : vector<128xf32>
    %131 = vector.multi_reduction <add>, %130, %cst_26 [0] : vector<128x128xf32> to vector<128xf32>
    %132 = vector.extract_strided_slice %2 {offsets = [7, 0], sizes = [1, 128], strides = [1, 1]} : vector<8x128xi32> to vector<1x128xi32>
    %133 = vector.shape_cast %132 : vector<1x128xi32> to vector<128xi32>
    %134 = vector.shape_cast %133 : vector<128xi32> to vector<1x128xi32>
    %135 = vector.broadcast %134 : vector<1x128xi32> to vector<32x128xi32>
    %136 = arith.cmpi eq, %4, %135 : vector<32x128xi32>
    %137 = arith.extui %136 : vector<32x128xi1> to vector<32x128xi32>
    %138 = arith.sitofp %137 : vector<32x128xi32> to vector<32x128xf32>
    %139 = vector.extract_strided_slice %3 {offsets = [7, 0], sizes = [1, 128], strides = [1, 1]} : vector<8x128xi32> to vector<1x128xi32>
    %140 = vector.shape_cast %139 : vector<1x128xi32> to vector<128xi32>
    %141 = vector.shape_cast %140 : vector<128xi32> to vector<1x128xi32>
    %142 = vector.broadcast %141 : vector<1x128xi32> to vector<48x128xi32>
    %143 = arith.cmpi eq, %5, %142 : vector<48x128xi32>
    %144 = arith.extui %143 : vector<48x128xi1> to vector<48x128xi32>
    %145 = arith.sitofp %144 : vector<48x128xi32> to vector<48x128xf32>
    %cst_27 = arith.constant dense<0.000000e+00> : vector<128x128xf32>
    %146 = tpu.matmul %0, %138, %cst_27 {dimension_numbers = #tpu.dot_dimension_numbers<[1], [0], [0], [1], [0, 0, 1, 1], [], []>} : vector<128x32xf32>, vector<32x128xf32>, vector<128x128xf32> -> vector<128x128xf32>
    %cst_28 = arith.constant dense<0.000000e+00> : vector<128x128xf32>
    %147 = tpu.matmul %1, %145, %cst_28 {dimension_numbers = #tpu.dot_dimension_numbers<[1], [0], [0], [1], [0, 0, 1, 1], [], []>} : vector<128x48xf32>, vector<48x128xf32>, vector<128x128xf32> -> vector<128x128xf32>
    %148 = arith.mulf %146, %147 : vector<128x128xf32>
    %cst_29 = arith.constant dense<0.000000e+00> : vector<128xf32>
    %149 = vector.multi_reduction <add>, %148, %cst_29 [0] : vector<128x128xf32> to vector<128xf32>
    %150 = vector.shape_cast %23 : vector<128xf32> to vector<1x128xf32>
    %151 = vector.shape_cast %41 : vector<128xf32> to vector<1x128xf32>
    %152 = vector.shape_cast %59 : vector<128xf32> to vector<1x128xf32>
    %153 = vector.shape_cast %77 : vector<128xf32> to vector<1x128xf32>
    %154 = vector.shape_cast %95 : vector<128xf32> to vector<1x128xf32>
    %155 = vector.shape_cast %113 : vector<128xf32> to vector<1x128xf32>
    %156 = vector.shape_cast %131 : vector<128xf32> to vector<1x128xf32>
    %157 = vector.shape_cast %149 : vector<128xf32> to vector<1x128xf32>
    %158 = tpu.concatenate %150, %151, %152, %153, %154, %155, %156, %157 in 0 : vector<1x128xf32>, vector<1x128xf32>, vector<1x128xf32>, vector<1x128xf32>, vector<1x128xf32>, vector<1x128xf32>, vector<1x128xf32>, vector<1x128xf32> -> vector<8x128xf32>
    %c0_30 = arith.constant 0 : index
    %c0_31 = arith.constant 0 : index
    %159 = vector.load %arg5[%c0_30, %c0_31] : memref<8x128xf32, #tpu.memory_space<vmem>>, vector<8x128xf32>
    tpu.vector_store %arg5[%c0_30, %c0_31], %158 {strides = array<i32>} : memref<8x128xf32, #tpu.memory_space<vmem>>, vector<8x128xf32>,
    return
  }
  func.func @transform_0(%arg0: i32) -> (i32, i32) {
    %c0_i32 = arith.constant 0 : i32
    %c0_i32_0 = arith.constant 0 : i32
    return %arg0, %c0_i32 : i32, i32
  }
  func.func @transform_1(%arg0: i32) -> (i32, i32) {
    %c0_i32 = arith.constant 0 : i32
    %c0_i32_0 = arith.constant 0 : i32
    return %arg0, %c0_i32 : i32, i32
  }
  func.func @transform_2(%arg0: i32) -> (i32, i32) {
    %c0_i32 = arith.constant 0 : i32
    %c0_i32_0 = arith.constant 0 : i32
    %c0_i32_1 = arith.constant 0 : i32
    return %c0_i32, %c0_i32_0 : i32, i32
  }
  func.func @transform_3(%arg0: i32) -> (i32, i32) {
    %c0_i32 = arith.constant 0 : i32
    %c0_i32_0 = arith.constant 0 : i32
    %c0_i32_1 = arith.constant 0 : i32
    return %c0_i32, %c0_i32_0 : i32, i32
  }
  func.func @transform_4(%arg0: i32) -> (i32, i32) {
    %c0_i32 = arith.constant 0 : i32
    %c0_i32_0 = arith.constant 0 : i32
    return %arg0, %c0_i32 : i32, i32
  }
}

</mosaic_0001>

<bundles_post_ra>
// kernel: tpu_custom_call.1
= control target key start
LH: loop header
LB: loop body
LE: loop exit
PB: predicated region body
PF: predicated region fallthrough
CT: control target
= control target key end

     0   :  { %v52_v1 = vlaneseq  ;;  %s3391_s0 = inlined_call_operand.vmem [shape: s32[8,128], index: 0, kind: input, shape index: {}]   ;;  %s3392_s1 = inlined_call_operand.vmem [shape: s32[8,128], index: 1, kind: input, shape index: {}]   ;;  %s3393_s2 = inlined_call_operand.vmem [shape: f32[128,32], index: 2, kind: input, shape index: {}]   ;;  %s3394_s3 = inlined_call_operand.vmem [shape: f32[128,48], index: 3, kind: input, shape index: {}]   ;;  %s3395_s4 = inlined_call_operand.hbm [shape: f32[8,128], index: 4, kind: output, shape index: {}]  }
   0x1   :  { %v2286_v0 = vld [vmem:[%s3392_s1] sm:$0xff] }
   0x2   :  { %v2291_v2 = vld [vmem:[%s3391_s0] sm:$0xff]  ;;  %v2293_v3 = vshrl.u32 %v52_v1, 7  ;;  %v72_v4 = vperm.slane %v2286_v0, 0  ;;  %v2298_v6 = vperm.slane %v2286_v0, 1 }
   0x3   :  { %v356_v5 = vperm.slane %v2291_v2, 1  ;;  %v59_v7 = vperm.slane %v2291_v2, 0 }
   0x4   :  { %9 = vsyncpa [#allocation3], 0  ;;  %v2302_v8 = vadd.s32 40, %v2293_v3  ;;  %v2305_v9 = vadd.s32 24, %v2293_v3  ;;  %v2308_v10 = vadd.s32 32, %v2293_v3  ;;  %v2311_v11 = vadd.s32 16, %v2293_v3 }
   0x5   :  { %v2314_v12 = vadd.s32 8, %v2293_v3  ;;  %v3396_v13 = vmov 1.0   ;;  %v2337_v14 = vperm.slane %v2286_v0, 2  ;;  %vm357_vm12 = vcmp.eq.s32.totalorder %v2293_v3, %v356_v5  ;;  %v2351_v15 = vld [vmem:[%s3393_s2] sm:$0xff]  ;;  %v2406_v20 = vld [vmem:[%s3393_s2 + $0x8] sm:$0xff]  ;;  %v2437_v22 = vld [vmem:[%s3393_s2 + $0x10] sm:$0xff] }
   0x6   :  { %vm78_vm0 = vcmp.eq.s32.totalorder %v2302_v8, %v72_v4  ;;  %vm360_vm1 = vcmp.eq.s32.totalorder %v2305_v9, %v356_v5  ;;  %vm375_vm2 = vcmp.eq.s32.totalorder %v2302_v8, %v2298_v6  ;;  %vm77_vm3 = vcmp.eq.s32.totalorder %v2308_v10, %v72_v4  ;;  %v2383_v19 = vld [vmem:[%s3394_s3] sm:$0xff]  ;;  %v2424_v21 = vld [vmem:[%s3394_s3 + $0x8] sm:$0xff]  ;;  %v2450_v23 = vld [vmem:[%s3394_s3 + $0x10] sm:$0xff]  ;;  %s1771_s9 = sshll.u32 %s3395_s4, 4  ;;  %s1772_s9 = int_to_ptr.hbm [resolvable:$true] %s1771_s9 }
   0x7   :  { %1810 = vmatpush.msk.msra.mxu1 %vm78_vm0, %v3396_v13  ;;  %1842 = vmatpush.msk.msra.mxu2 %vm360_vm1, %v3396_v13  ;;  %vm359_vm4 = vcmp.eq.s32.totalorder %v2311_v11, %v356_v5  ;;  %vm374_vm5 = vcmp.eq.s32.totalorder %v2308_v10, %v2298_v6  ;;  %vm63_vm6 = vcmp.eq.s32.totalorder %v2305_v9, %v59_v7  ;;  %vm91_vm15 = vcmask 261120   ;;  %v2461_v24 = vld [vmem:[%s3393_s2 + $0x18] sm:$0xff]  ;;  %v2479_v26 = vld [vmem:[%s3393_s2 + $0x20] sm:$0xff]  ;;  %v2500_v28 = vld [vmem:[%s3393_s2 + $0x28] sm:$0xff] }
   0x8   :  { %1862 = vmatpush.msk.msra.mxu3 %vm375_vm2, %v3396_v13  ;;  %1790 = vmatpush.msk.msra.mxu0 %vm63_vm6, %v3396_v13  ;;  %vm76_vm7 = vcmp.eq.s32.totalorder %v2305_v9, %v72_v4  ;;  %vm358_vm8 = vcmp.eq.s32.totalorder %v2314_v12, %v356_v5  ;;  %vm373_vm9 = vcmp.eq.s32.totalorder %v2305_v9, %v2298_v6  ;;  %v2358_v16 = vperm.slane %v2291_v2, 2  ;;  %v2468_v25 = vld [vmem:[%s3394_s3 + $0x18] sm:$0xff]  ;;  %v2488_v27 = vld [vmem:[%s3394_s3 + $0x20] sm:$0xff]  ;;  %v2514_v29 = vld [vmem:[%s3394_s3 + $0x28] sm:$0xff] }
   0x9   :  { %1811 = vmatpush.msk.msra.mxu1 %vm77_vm3, %v3396_v13  ;;  %1843 = vmatpush.msk.msra.mxu2 %vm359_vm4, %v3396_v13  ;;  %vm62_vm10 = vcmp.eq.s32.totalorder %v2311_v11, %v59_v7  ;;  %vm75_vm11 = vcmp.eq.s32.totalorder %v2311_v11, %v72_v4  ;;  %vm61_vm13 = vcmp.eq.s32.totalorder %v2314_v12, %v59_v7  ;;  %v2367_v17 = vperm.slane %v2286_v0, 3  ;;  %v2527_v30 = vld [vmem:[%s3393_s2 + $0x30] sm:$0xff]  ;;  %v2545_v32 = vld [vmem:[%s3393_s2 + $0x38] sm:$0xff]  ;;  %v2569_v34 = vld [vmem:[%s3393_s2 + $0x40] sm:$0xff] }
   0xa   :  { %1863 = vmatpush.msk.msra.mxu3 %vm374_vm5, %v3396_v13  ;;  %1791 = vmatpush.msk.msra.mxu0 %vm62_vm10, %v3396_v13  ;;  %vm372_vm14 = vcmp.eq.s32.totalorder %v2311_v11, %v2298_v6  ;;  %vm74_vm0 = vcmp.eq.s32.totalorder %v2314_v12, %v72_v4  ;;  %vm60_vm1 = vcmp.eq.s32.totalorder %v2293_v3, %v59_v7  ;;  %v2370_v18 = vperm.slane %v2291_v2, 3  ;;  %v2534_v31 = vld [vmem:[%s3394_s3 + $0x30] sm:$0xff]  ;;  %v2556_v33 = vld [vmem:[%s3394_s3 + $0x38] sm:$0xff]  ;;  %v2576_v35 = vld [vmem:[%s3394_s3 + $0x40] sm:$0xff] }
   0xb   :  { %1812 = vmatpush.msk.msra.mxu1 %vm76_vm7, %v3396_v13  ;;  %1844 = vmatpush.msk.msra.mxu2 %vm358_vm8, %v3396_v13  ;;  %vm371_vm2 = vcmp.eq.s32.totalorder %v2314_v12, %v2298_v6  ;;  %vm574_vm3 = vcmp.eq.s32.totalorder %v2302_v8, %v2337_v14  ;;  %vm73_vm4 = vcmp.eq.s32.totalorder %v2293_v3, %v72_v4  ;;  %vm205_vm6 = vcmask 392192   ;;  %v2587_v36 = vld [vmem:[%s3393_s2 + $0x48] sm:$0xff]  ;;  %v2611_v38 = vld [vmem:[%s3393_s2 + $0x50] sm:$0xff]  ;;  %v2635_v40 = vld [vmem:[%s3393_s2 + $0x58] sm:$0xff] }
   0xc   :  { %1864 = vmatpush.msk.msra.mxu3 %vm373_vm9, %v3396_v13  ;;  %1792 = vmatpush.msk.msra.mxu0 %vm61_vm13, %v3396_v13  ;;  %vm370_vm5 = vcmp.eq.s32.totalorder %v2293_v3, %v2298_v6  ;;  %vm559_vm7 = vcmp.eq.s32.totalorder %v2305_v9, %v2358_v16  ;;  %vm773_vm8 = vcmp.eq.s32.totalorder %v2302_v8, %v2367_v17  ;;  %v2598_v37 = vld [vmem:[%s3394_s3 + $0x48] sm:$0xff]  ;;  %v2624_v39 = vld [vmem:[%s3394_s3 + $0x50] sm:$0xff]  ;;  %v2642_v41 = vld [vmem:[%s3394_s3 + $0x58] sm:$0xff]  ;;  %v2665_v44 = vperm.slane %v2286_v0, 4 }
   0xd   :  { %1813 = vmatpush.msk.msra.mxu1 %vm75_vm11, %v3396_v13  ;;  %1845 = vmatpush.msk.msra.mxu2 %vm357_vm12, %v3396_v13  ;;  %vm758_vm9 = vcmp.eq.s32.totalorder %v2305_v9, %v2370_v18  ;;  %vm573_vm10 = vcmp.eq.s32.totalorder %v2308_v10, %v2337_v14  ;;  %vm772_vm11 = vcmp.eq.s32.totalorder %v2308_v10, %v2367_v17  ;;  %v2653_v42 = vld [vmem:[%s3393_s2 + $0x60] sm:$0xff]  ;;  %v2674_v45 = vld [vmem:[%s3393_s2 + $0x68] sm:$0xff]  ;;  %v2679_v46 = vperm.slane %v2286_v0, 5  ;;  %v2707_v50 = vld [vmem:[%s3393_s2 + $0x70] sm:$0xff] }
   0xe   :  { %1865 = vmatpush.msk.msra.mxu3 %vm372_vm14, %v3396_v13  ;;  %1846 = vmatmul.msk.f32.vlgmr.msra.gmra.mxu2 %vm91_vm15, %v2351_v15  ;;  %vm558_vm12 = vcmp.eq.s32.totalorder %v2311_v11, %v2358_v16  ;;  %vm757_vm13 = vcmp.eq.s32.totalorder %v2311_v11, %v2370_v18  ;;  %vm572_vm14 = vcmp.eq.s32.totalorder %v2305_v9, %v2337_v14  ;;  %v2660_v43 = vld [vmem:[%s3394_s3 + $0x60] sm:$0xff]  ;;  %v2690_v47 = vld [vmem:[%s3394_s3 + $0x68] sm:$0xff]  ;;  %v2697_v48 = vperm.slane %v2291_v2, 4  ;;  %v2720_v51 = vld [vmem:[%s3394_s3 + $0x70] sm:$0xff] }
   0xf   :  { %1814 = vmatpush.msk.msra.mxu1 %vm74_vm0, %v3396_v13  ;;  %1793 = vmatpush.msk.msra.mxu0 %vm60_vm1, %v3396_v13  ;;  %vm771_vm0 = vcmp.eq.s32.totalorder %v2305_v9, %v2367_v17  ;;  %vm571_vm1 = vcmp.eq.s32.totalorder %v2311_v11, %v2337_v14  ;;  %3408 = vst [vmem:[#allocation5_spill] sm:$0xff] %v2674_v45  ;;  %v2700_v49 = vperm.slane %v2291_v2, 5  ;;  %v2731_v52 = vld [vmem:[%s3393_s2 + $0x78] sm:$0xff] }
  0x10   :  { %1866 = vmatpush.msk.msra.mxu3 %vm371_vm2, %v3396_v13  ;;  %1914 = vmatpush.msk.msrb.mxu2 %vm574_vm3, %v3396_v13  ;;  %vm770_vm2 = vcmp.eq.s32.totalorder %v2311_v11, %v2367_v17  ;;  %vm557_vm3 = vcmp.eq.s32.totalorder %v2314_v12, %v2358_v16  ;;  %3409 = vst [vmem:[#allocation6_spill] sm:$0xff] %v2690_v47  ;;  %v2738_v53 = vld [vmem:[%s3394_s3 + $0x78] sm:$0xff] }
  0x11   :  { %1815 = vmatpush.msk.msra.mxu1 %vm73_vm4, %v3396_v13  ;;  %1794 = vmatmul.msk.f32.vlgmr.msra.gmra.mxu0 %vm91_vm15, %v2351_v15  ;;  %vm756_vm4 = vcmp.eq.s32.totalorder %v2314_v12, %v2370_v18  ;;  %3410 = vst [vmem:[#allocation7_spill] sm:$0xff] %v2707_v50 }
  0x12   :  { %1867 = vmatpush.msk.msra.mxu3 %vm370_vm5, %v3396_v13  ;;  %1816 = vmatmul.msk.f32.vlgmr.msra.gmra.mxu1 %vm205_vm6, %v2383_v19  ;;  %vm570_vm5 = vcmp.eq.s32.totalorder %v2314_v12, %v2337_v14  ;;  %3411 = vst [vmem:[#allocation8_spill] sm:$0xff] %v2731_v52 }
  0x13   :  { %1868 = vmatmul.msk.f32.vlgmr.msra.gmra.mxu3 %vm205_vm6, %v2383_v19  ;;  %1894 = vmatpush.msk.msrb.mxu0 %vm559_vm7, %v3396_v13  ;;  %vm769_vm7 = vcmp.eq.s32.totalorder %v2314_v12, %v2367_v17  ;;  %3412 = vst [vmem:[#allocation9_spill] sm:$0xff] %v2738_v53 }
  0x14   :  { %1966 = vmatpush.msk.msrb.mxu3 %vm773_vm8, %v3396_v13  ;;  %1946 = vmatpush.msk.msrb.mxu1 %vm758_vm9, %v3396_v13  ;;  %vm556_vm8 = vcmp.eq.s32.totalorder %v2293_v3, %v2358_v16  ;;  %vm755_vm9 = vcmp.eq.s32.totalorder %v2293_v3, %v2370_v18 }
  0x15   :  { %1915 = vmatpush.msk.msrb.mxu2 %vm573_vm10, %v3396_v13  ;;  %1895 = vmatpush.msk.msrb.mxu0 %vm558_vm12, %v3396_v13  ;;  %vm569_vm10 = vcmp.eq.s32.totalorder %v2293_v3, %v2337_v14  ;;  %vm972_vm12 = vcmp.eq.s32.totalorder %v2302_v8, %v2665_v44 }
  0x16   :  { %1847 = vmatmul.msk.f32.gmra.mxu2 %vm91_vm15, %v2406_v20  ;;  %1967 = vmatpush.msk.msrb.mxu3 %vm772_vm11, %v3396_v13  ;;  %vm768_vm11 = vcmp.eq.s32.totalorder %v2293_v3, %v2367_v17 }
  0x17   :  { %1947 = vmatpush.msk.msrb.mxu1 %vm757_vm13, %v3396_v13  ;;  %1916 = vmatpush.msk.msrb.mxu2 %vm572_vm14, %v3396_v13  ;;  %vm1171_vm13 = vcmp.eq.s32.totalorder %v2302_v8, %v2679_v46  ;;  %vm957_vm14 = vcmp.eq.s32.totalorder %v2305_v9, %v2697_v48 }
  0x18   :  { %1968 = vmatpush.msk.msrb.mxu3 %vm771_vm0, %v3396_v13  ;;  %1896 = vmatpush.msk.msrb.mxu0 %vm557_vm3, %v3396_v13  ;;  %vm1156_vm0 = vcmp.eq.s32.totalorder %v2305_v9, %v2700_v49  ;;  %vm956_vm3 = vcmp.eq.s32.totalorder %v2311_v11, %v2697_v48 }
  0x19   :  { %1795 = vmatmul.msk.f32.gmra.mxu0 %vm91_vm15, %v2406_v20  ;;  %1917 = vmatpush.msk.msrb.mxu2 %vm571_vm1, %v3396_v13  ;;  %vm971_vm1 = vcmp.eq.s32.totalorder %v2308_v10, %v2665_v44 }
  0x1a   :  { %1817 = vmatmul.msk.f32.gmra.mxu1 %vm205_vm6, %v2424_v21  ;;  %1969 = vmatpush.msk.msrb.mxu3 %vm770_vm2, %v3396_v13  ;;  %vm1170_vm2 = vcmp.eq.s32.totalorder %v2308_v10, %v2679_v46 }
  0x1b   :  { %1869 = vmatmul.msk.f32.gmra.mxu3 %vm205_vm6, %v2424_v21  ;;  %1948 = vmatpush.msk.msrb.mxu1 %vm756_vm4, %v3396_v13  ;;  %vm1155_vm4 = vcmp.eq.s32.totalorder %v2311_v11, %v2700_v49 }
  0x1c   :  { %1918 = vmatpush.msk.msrb.mxu2 %vm570_vm5, %v3396_v13  ;;  %1970 = vmatpush.msk.msrb.mxu3 %vm769_vm7, %v3396_v13  ;;  %vm970_vm5 = vcmp.eq.s32.totalorder %v2305_v9, %v2665_v44  ;;  %vm1169_vm7 = vcmp.eq.s32.totalorder %v2305_v9, %v2679_v46 }
  0x1d   :  { %1897 = vmatpush.msk.msrb.mxu0 %vm556_vm8, %v3396_v13  ;;  %1949 = vmatpush.msk.msrb.mxu1 %vm755_vm9, %v3396_v13  ;;  %vm969_vm8 = vcmp.eq.s32.totalorder %v2311_v11, %v2665_v44  ;;  %vm1168_vm9 = vcmp.eq.s32.totalorder %v2311_v11, %v2679_v46 }
  0x1e   :  { %1848 = vmatmul.msk.f32.gmra.mxu2 %vm91_vm15, %v2437_v22  ;;  %1971 = vmatpush.msk.msrb.mxu3 %vm768_vm11, %v3396_v13  ;;  %vm1154_vm11 = vcmp.eq.s32.totalorder %v2314_v12, %v2700_v49 }
  0x1f   :  { %1919 = vmatpush.msk.msrb.mxu2 %vm569_vm10, %v3396_v13  ;;  %1998 = vmatpush.msk.msra.mxu0 %vm957_vm14, %v3396_v13  ;;  %vm955_vm10 = vcmp.eq.s32.totalorder %v2314_v12, %v2697_v48  ;;  %vm954_vm14 = vcmp.eq.s32.totalorder %v2293_v3, %v2697_v48 }
  0x20   :  { %2070 = vmatpush.msk.msra.mxu3 %vm1171_vm13, %v3396_v13  ;;  %2050 = vmatpush.msk.msra.mxu1 %vm1156_vm0, %v3396_v13  ;;  %vm1167_vm13 = vcmp.eq.s32.totalorder %v2314_v12, %v2679_v46  ;;  %vm1153_vm0 = vcmp.eq.s32.totalorder %v2293_v3, %v2700_v49 }
  0x21   :  { %1796 = vmatmul.msk.f32.gmra.mxu0 %vm91_vm15, %v2437_v22  ;;  %2018 = vmatpush.msk.msra.mxu2 %vm972_vm12, %v3396_v13  ;;  %vm968_vm12 = vcmp.eq.s32.totalorder %v2314_v12, %v2665_v44 }
  0x22   :  { %1818 = vmatmul.msk.f32.gmra.mxu1 %vm205_vm6, %v2450_v23  ;;  %2071 = vmatpush.msk.msra.mxu3 %vm1170_vm2, %v3396_v13  ;;  %vm1166_vm2 = vcmp.eq.s32.totalorder %v2293_v3, %v2679_v46 }
  0x23   :  { %1870 = vmatmul.msk.f32.gmra.mxu3 %vm205_vm6, %v2450_v23  ;;  %2019 = vmatpush.msk.msra.mxu2 %vm971_vm1, %v3396_v13  ;;  %vm967_vm1 = vcmp.eq.s32.totalorder %v2293_v3, %v2665_v44 }
  0x24   :  { %1999 = vmatpush.msk.msra.mxu0 %vm956_vm3, %v3396_v13  ;;  %2051 = vmatpush.msk.msra.mxu1 %vm1155_vm4, %v3396_v13 }
  0x25   :  { %2020 = vmatpush.msk.msra.mxu2 %vm970_vm5, %v3396_v13  ;;  %2072 = vmatpush.msk.msra.mxu3 %vm1169_vm7, %v3396_v13 }
  0x26   :  { %1849 = vmatmul.msk.f32.gmra.mxu2 %vm91_vm15, %v2461_v24  ;;  %2000 = vmatpush.msk.msra.mxu0 %vm955_vm10, %v3396_v13 }
  0x27   :  { %2021 = vmatpush.msk.msra.mxu2 %vm969_vm8, %v3396_v13  ;;  %2073 = vmatpush.msk.msra.mxu3 %vm1168_vm9, %v3396_v13 }
  0x28   :  { %2052 = vmatpush.msk.msra.mxu1 %vm1154_vm11, %v3396_v13 }
  0x29   :  { %1797 = vmatmul.msk.f32.gmra.mxu0 %vm91_vm15, %v2461_v24 }
  0x2a   :  { %1819 = vmatmul.msk.f32.gmra.mxu1 %vm205_vm6, %v2468_v25 }
  0x2b   :  { %1871 = vmatmul.msk.f32.gmra.mxu3 %vm205_vm6, %v2468_v25 }
  0x2e   :  { %1850 = vmatmul.msk.f32.gmra.mxu2 %vm91_vm15, %v2479_v26 }
  0x31   :  { %1798 = vmatmul.msk.f32.gmra.mxu0 %vm91_vm15, %v2479_v26 }
  0x32   :  { %1820 = vmatmul.msk.f32.gmra.mxu1 %vm205_vm6, %v2488_v27 }
  0x33   :  { %1872 = vmatmul.msk.f32.gmra.mxu3 %vm205_vm6, %v2488_v27 }
  0x36   :  { %1851 = vmatmul.msk.f32.gmra.mxu2 %vm91_vm15, %v2500_v28 }
  0x39   :  { %1799 = vmatmul.msk.f32.gmra.mxu0 %vm91_vm15, %v2500_v28 }
  0x3a   :  { %1821 = vmatmul.msk.f32.gmra.mxu1 %vm205_vm6, %v2514_v29 }
  0x3b   :  { %1873 = vmatmul.msk.f32.gmra.mxu3 %vm205_vm6, %v2514_v29 }
  0x3e   :  { %1852 = vmatmul.msk.f32.gmra.mxu2 %vm91_vm15, %v2527_v30 }
  0x41   :  { %1800 = vmatmul.msk.f32.gmra.mxu0 %vm91_vm15, %v2527_v30 }
  0x42   :  { %1822 = vmatmul.msk.f32.gmra.mxu1 %vm205_vm6, %v2534_v31 }
  0x43   :  { %1874 = vmatmul.msk.f32.gmra.mxu3 %vm205_vm6, %v2534_v31 }
  0x46   :  { %1853 = vmatmul.msk.f32.gmra.mxu2 %vm91_vm15, %v2545_v32 }
  0x49   :  { %1801 = vmatmul.msk.f32.gmra.mxu0 %vm91_vm15, %v2545_v32 }
  0x4a   :  { %1823 = vmatmul.msk.f32.gmra.mxu1 %vm205_vm6, %v2556_v33 }
  0x4b   :  { %1875 = vmatmul.msk.f32.gmra.mxu3 %vm205_vm6, %v2556_v33 }
  0x4e   :  { %1854 = vmatmul.msk.f32.gmra.mxu2 %vm91_vm15, %v2569_v34 }
  0x51   :  { %1802 = vmatmul.msk.f32.gmra.mxu0 %vm91_vm15, %v2569_v34 }
  0x52   :  { %1824 = vmatmul.msk.f32.gmra.mxu1 %vm205_vm6, %v2576_v35 }
  0x53   :  { %1876 = vmatmul.msk.f32.gmra.mxu3 %vm205_vm6, %v2576_v35 }
  0x56   :  { %1855 = vmatmul.msk.f32.gmra.mxu2 %vm91_vm15, %v2587_v36 }
  0x59   :  { %1803 = vmatmul.msk.f32.gmra.mxu0 %vm91_vm15, %v2587_v36 }
  0x5a   :  { %1825 = vmatmul.msk.f32.gmra.mxu1 %vm205_vm6, %v2598_v37 }
  0x5b   :  { %1877 = vmatmul.msk.f32.gmra.mxu3 %vm205_vm6, %v2598_v37 }
  0x5e   :  { %1856 = vmatmul.msk.f32.gmra.mxu2 %vm91_vm15, %v2611_v38 }
  0x61   :  { %1804 = vmatmul.msk.f32.gmra.mxu0 %vm91_vm15, %v2611_v38 }
  0x62   :  { %1826 = vmatmul.msk.f32.gmra.mxu1 %vm205_vm6, %v2624_v39 }
  0x63   :  { %1878 = vmatmul.msk.f32.gmra.mxu3 %vm205_vm6, %v2624_v39 }
  0x66   :  { %1857 = vmatmul.msk.f32.gmra.mxu2 %vm91_vm15, %v2635_v40 }
  0x69   :  { %1805 = vmatmul.msk.f32.gmra.mxu0 %vm91_vm15, %v2635_v40 }
  0x6a   :  { %1827 = vmatmul.msk.f32.gmra.mxu1 %vm205_vm6, %v2642_v41 }
  0x6b   :  { %1879 = vmatmul.msk.f32.gmra.mxu3 %vm205_vm6, %v2642_v41 }
  0x6e   :  { %1858 = vmatmul.msk.f32.gmra.mxu2 %vm91_vm15, %v2653_v42 }
  0x71   :  { %1806 = vmatmul.msk.f32.gmra.mxu0 %vm91_vm15, %v2653_v42 }
  0x72   :  { %1828 = vmatmul.msk.f32.gmra.mxu1 %vm205_vm6, %v2660_v43 }
  0x73   :  { %1880 = vmatmul.msk.f32.gmra.mxu3 %vm205_vm6, %v2660_v43 }
  0x76   :  { %1859 = vmatmul.msk.f32.gmra.mxu2 %vm91_vm15, %v2674_v45 }
  0x79   :  { %1807 = vmatmul.msk.f32.gmra.mxu0 %vm91_vm15, %v2674_v45 }
  0x7a   :  { %1829 = vmatmul.msk.f32.gmra.mxu1 %vm205_vm6, %v2690_v47 }
  0x7b   :  { %1881 = vmatmul.msk.f32.gmra.mxu3 %vm205_vm6, %v2690_v47 }
  0x7e   :  { %1860 = vmatmul.msk.f32.gmra.mxu2 %vm91_vm15, %v2707_v50 }
  0x81   :  { %1808 = vmatmul.msk.f32.gmra.mxu0 %vm91_vm15, %v2707_v50 }
  0x82   :  { %1830 = vmatmul.msk.f32.gmra.mxu1 %vm205_vm6, %v2720_v51 }
  0x83   :  { %1882 = vmatmul.msk.f32.gmra.mxu3 %vm205_vm6, %v2720_v51 }
  0x86   :  { %1861 = vmatmul.msk.f32.gmra.mxu2 %vm91_vm15, %v2731_v52 }
  0x89   :  { %1809 = vmatmul.msk.f32.gmra.mxu0 %vm91_vm15, %v2731_v52 }
  0x8a   :  { %1831 = vmatmul.msk.f32.gmra.mxu1 %vm205_vm6, %v2738_v53 }
  0x8b   :  { %1883 = vmatmul.msk.f32.gmra.mxu3 %vm205_vm6, %v2738_v53 }
  0x8e   :  { %1920 = vmatmul.msk.f32.vlgmr.msrb.gmra.mxu2 %vm205_vm6, %v2383_v19  ;;  %v2754_v54 = vpop.f32.mrf.mxu0 }
  0x8f   :  { %v2756_v55 = vpop.f32.mrf.mxu1 }
  0x91   :  { %v405_v56 = vpop.f32.mrf.mxu2  ;;  %1898 = vmatmul.msk.f32.vlgmr.msrb.gmra.mxu0 %vm91_vm15, %v2351_v15 }
  0x92   :  { %1950 = vmatmul.msk.f32.vlgmr.msrb.gmra.mxu1 %vm91_vm15, %v2351_v15 }
  0x93   :  { %1972 = vmatmul.msk.f32.vlgmr.msrb.gmra.mxu3 %vm205_vm6, %v2383_v19 }
  0x96   :  { %v470_v57 = vpop.f32.mrf.mxu3  ;;  %1921 = vmatmul.msk.f32.gmra.mxu2 %vm205_vm6, %v2424_v21  ;;  %v2766_v58 = vpop.f32.mrf.mxu0 }
  0x97   :  { %v518_v59 = vmul.f32 %v470_v57, %v405_v56  ;;  %v2768_v60 = vpop.f32.mrf.mxu1 }
  0x99   :  { %v408_v61 = vpop.f32.mrf.mxu2  ;;  %1899 = vmatmul.msk.f32.gmra.mxu0 %vm91_vm15, %v2406_v20 }
  0x9a   :  { %1951 = vmatmul.msk.f32.gmra.mxu1 %vm91_vm15, %v2406_v20 }
  0x9b   :  { %1973 = vmatmul.msk.f32.gmra.mxu3 %vm205_vm6, %v2424_v21 }
  0x9e   :  { %v473_v62 = vpop.f32.mrf.mxu3  ;;  %1922 = vmatmul.msk.f32.gmra.mxu2 %vm205_vm6, %v2450_v23  ;;  %v2787_v63 = vpop.f32.mrf.mxu0 }
  0x9f   :  { %v519_v1 = vmul.f32 %v473_v62, %v408_v61  ;;  %v2789_v4 = vpop.f32.mrf.mxu1 }
  0xa1   :  { %v534_v5 = vadd.f32 %v519_v1, %v518_v59  ;;  %v411_v6 = vpop.f32.mrf.mxu2  ;;  %1900 = vmatmul.msk.f32.gmra.mxu0 %vm91_vm15, %v2437_v22 }
  0xa2   :  { %1952 = vmatmul.msk.f32.gmra.mxu1 %vm91_vm15, %v2437_v22 }
  0xa3   :  { %1974 = vmatmul.msk.f32.gmra.mxu3 %vm205_vm6, %v2450_v23 }
  0xa6   :  { %v476_v7 = vpop.f32.mrf.mxu3  ;;  %1923 = vmatmul.msk.f32.gmra.mxu2 %vm205_vm6, %v2468_v25  ;;  %v2802_v14 = vpop.f32.mrf.mxu0 }
  0xa7   :  { %v520_v16 = vmul.f32 %v476_v7, %v411_v6  ;;  %v2804_v17 = vpop.f32.mrf.mxu1 }
  0xa9   :  { %v535_v18 = vadd.f32 %v534_v5, %v520_v16  ;;  %v414_v56 = vpop.f32.mrf.mxu2  ;;  %1901 = vmatmul.msk.f32.gmra.mxu0 %vm91_vm15, %v2461_v24 }
  0xaa   :  { %1953 = vmatmul.msk.f32.gmra.mxu1 %vm91_vm15, %v2461_v24 }
  0xab   :  { %1975 = vmatmul.msk.f32.gmra.mxu3 %vm205_vm6, %v2468_v25 }
  0xae   :  { %v479_v57 = vpop.f32.mrf.mxu3  ;;  %1924 = vmatmul.msk.f32.gmra.mxu2 %vm205_vm6, %v2488_v27  ;;  %v2814_v59 = vpop.f32.mrf.mxu0 }
  0xaf   :  { %v521_v61 = vmul.f32 %v479_v57, %v414_v56  ;;  %v2816_v62 = vpop.f32.mrf.mxu1 }
  0xb0   :  { %3413 = vst [vmem:[#allocation10_spill] sm:$0xff] %v2816_v62 }
  0xb1   :  { %v536_v1 = vadd.f32 %v535_v18, %v521_v61  ;;  %v417_v5 = vpop.f32.mrf.mxu2  ;;  %1902 = vmatmul.msk.f32.gmra.mxu0 %vm91_vm15, %v2479_v26 }
  0xb2   :  { %1954 = vmatmul.msk.f32.gmra.mxu1 %vm91_vm15, %v2479_v26 }
  0xb3   :  { %1976 = vmatmul.msk.f32.gmra.mxu3 %vm205_vm6, %v2488_v27 }
  0xb6   :  { %v482_v6 = vpop.f32.mrf.mxu3  ;;  %1925 = vmatmul.msk.f32.gmra.mxu2 %vm205_vm6, %v2514_v29  ;;  %v2832_v7 = vpop.f32.mrf.mxu0 }
  0xb7   :  { %3414 = vst [vmem:[#allocation11_spill] sm:$0xff] %v2832_v7  ;;  %v522_v16 = vmul.f32 %v482_v6, %v417_v5  ;;  %v2834_v18 = vpop.f32.mrf.mxu1 }
  0xb8   :  { %3415 = vst [vmem:[#allocation12_spill] sm:$0xff] %v2834_v18 }
  0xb9   :  { %v537_v56 = vadd.f32 %v536_v1, %v522_v16  ;;  %v420_v57 = vpop.f32.mrf.mxu2  ;;  %1903 = vmatmul.msk.f32.gmra.mxu0 %vm91_vm15, %v2500_v28 }
  0xba   :  { %1955 = vmatmul.msk.f32.gmra.mxu1 %vm91_vm15, %v2500_v28 }
  0xbb   :  { %1977 = vmatmul.msk.f32.gmra.mxu3 %vm205_vm6, %v2514_v29 }
  0xbe   :  { %v485_v61 = vpop.f32.mrf.mxu3  ;;  %1926 = vmatmul.msk.f32.gmra.mxu2 %vm205_vm6, %v2534_v31  ;;  %v2850_v1 = vpop.f32.mrf.mxu0 }
  0xbf   :  { %3416 = vst [vmem:[#allocation13_spill] sm:$0xff] %v2850_v1  ;;  %v523_v5 = vmul.f32 %v485_v61, %v420_v57  ;;  %v2852_v6 = vpop.f32.mrf.mxu1 }
  0xc0   :  { %3417 = vst [vmem:[#allocation14_spill] sm:$0xff] %v2852_v6 }
  0xc1   :  { %v538_v16 = vadd.f32 %v537_v56, %v523_v5  ;;  %v423_v18 = vpop.f32.mrf.mxu2  ;;  %1904 = vmatmul.msk.f32.gmra.mxu0 %vm91_vm15, %v2527_v30 }
  0xc2   :  { %1956 = vmatmul.msk.f32.gmra.mxu1 %vm91_vm15, %v2527_v30 }
  0xc3   :  { %1978 = vmatmul.msk.f32.gmra.mxu3 %vm205_vm6, %v2534_v31 }
  0xc6   :  { %v488_v13 = vpop.f32.mrf.mxu3  ;;  %1927 = vmatmul.msk.f32.gmra.mxu2 %vm205_vm6, %v2556_v33  ;;  %v2862_v7 = vpop.f32.mrf.mxu0 }
  0xc7   :  { %3418 = vst [vmem:[#allocation15_spill] sm:$0xff] %v2862_v7  ;;  %v524_v57 = vmul.f32 %v488_v13, %v423_v18  ;;  %v2864_v61 = vpop.f32.mrf.mxu1  ;;  %v3420_v13 = vmov 1.0  }
  0xc8   :  { %3419 = vst [vmem:[#allocation16_spill] sm:$0xff] %v2864_v61  ;;  %2022 = vmatpush.msk.msra.mxu2 %vm968_vm12, %v3420_v13  ;;  %2074 = vmatpush.msk.msra.mxu3 %vm1167_vm13, %v3420_v13 }
  0xc9   :  { %v539_v56 = vadd.f32 %v538_v16, %v524_v57  ;;  %v426_v5 = vpop.f32.mrf.mxu2  ;;  %1905 = vmatmul.msk.f32.gmra.mxu0 %vm91_vm15, %v2545_v32  ;;  %2053 = vmatpush.msk.msra.mxu1 %vm1153_vm0, %v3420_v13 }
  0xca   :  { %1957 = vmatmul.msk.f32.gmra.mxu1 %vm91_vm15, %v2545_v32  ;;  %2001 = vmatpush.msk.msra.mxu0 %vm954_vm14, %v3420_v13 }
  0xcb   :  { %1979 = vmatmul.msk.f32.gmra.mxu3 %vm205_vm6, %v2556_v33  ;;  %2023 = vmatpush.msk.msra.mxu2 %vm967_vm1, %v3420_v13 }
  0xcc   :  { %2075 = vmatpush.msk.msra.mxu3 %vm1166_vm2, %v3420_v13 }
  0xce   :  { %v491_v18 = vpop.f32.mrf.mxu3  ;;  %1928 = vmatmul.msk.f32.gmra.mxu2 %vm205_vm6, %v2576_v35  ;;  %v2880_v16 = vpop.f32.mrf.mxu0 }
  0xcf   :  { %v525_v57 = vmul.f32 %v491_v18, %v426_v5  ;;  %v2882_v61 = vpop.f32.mrf.mxu1 }
  0xd1   :  { %v540_v7 = vadd.f32 %v539_v56, %v525_v57  ;;  %v429_v6 = vpop.f32.mrf.mxu2  ;;  %1906 = vmatmul.msk.f32.gmra.mxu0 %vm91_vm15, %v2569_v34 }
  0xd2   :  { %1958 = vmatmul.msk.f32.gmra.mxu1 %vm91_vm15, %v2569_v34 }
  0xd3   :  { %1980 = vmatmul.msk.f32.gmra.mxu3 %vm205_vm6, %v2576_v35 }
  0xd6   :  { %v494_v1 = vpop.f32.mrf.mxu3  ;;  %1929 = vmatmul.msk.f32.gmra.mxu2 %vm205_vm6, %v2598_v37  ;;  %v2892_v62 = vpop.f32.mrf.mxu0 }
  0xd7   :  { %v526_v5 = vmul.f32 %v494_v1, %v429_v6  ;;  %v2894_v18 = vpop.f32.mrf.mxu1 }
  0xd9   :  { %v541_v56 = vadd.f32 %v540_v7, %v526_v5  ;;  %v432_v57 = vpop.f32.mrf.mxu2  ;;  %1907 = vmatmul.msk.f32.gmra.mxu0 %vm91_vm15, %v2587_v36 }
  0xda   :  { %1959 = vmatmul.msk.f32.gmra.mxu1 %vm91_vm15, %v2587_v36 }
  0xdb   :  { %1981 = vmatmul.msk.f32.gmra.mxu3 %vm205_vm6, %v2598_v37 }
  0xde   :  { %v497_v7 = vpop.f32.mrf.mxu3  ;;  %1930 = vmatmul.msk.f32.gmra.mxu2 %vm205_vm6, %v2624_v39  ;;  %v2913_v48 = vpop.f32.mrf.mxu0 }
  0xdf   :  { %3421 = vst [vmem:[#allocation17_spill] sm:$0xff] %v2913_v48  ;;  %v527_v1 = vmul.f32 %v497_v7, %v432_v57  ;;  %v2915_v49 = vpop.f32.mrf.mxu1 }
  0xe0   :  { %3422 = vst [vmem:[#allocation18_spill] sm:$0xff] %v2915_v49 }
  0xe1   :  { %v542_v6 = vadd.f32 %v541_v56, %v527_v1  ;;  %v435_v5 = vpop.f32.mrf.mxu2  ;;  %1908 = vmatmul.msk.f32.gmra.mxu0 %vm91_vm15, %v2611_v38 }
  0xe2   :  { %1960 = vmatmul.msk.f32.gmra.mxu1 %vm91_vm15, %v2611_v38 }
  0xe3   :  { %1982 = vmatmul.msk.f32.gmra.mxu3 %vm205_vm6, %v2624_v39 }
  0xe6   :  { %v500_v44 = vpop.f32.mrf.mxu3  ;;  %1931 = vmatmul.msk.f32.gmra.mxu2 %vm205_vm6, %v2642_v41  ;;  %v2928_v56 = vpop.f32.mrf.mxu0 }
  0xe7   :  { %3423 = vst [vmem:[#allocation19_spill] sm:$0xff] %v2928_v56  ;;  %v528_v57 = vmul.f32 %v500_v44, %v435_v5  ;;  %v2930_v7 = vpop.f32.mrf.mxu1 }
  0xe8   :  { %3424 = vst [vmem:[#allocation20_spill] sm:$0xff] %v2930_v7 }
  0xe9   :  { %v543_v1 = vadd.f32 %v542_v6, %v528_v57  ;;  %v438_v49 = vpop.f32.mrf.mxu2  ;;  %1909 = vmatmul.msk.f32.gmra.mxu0 %vm91_vm15, %v2635_v40 }
  0xea   :  { %1961 = vmatmul.msk.f32.gmra.mxu1 %vm91_vm15, %v2635_v40 }
  0xeb   :  { %1983 = vmatmul.msk.f32.gmra.mxu3 %vm205_vm6, %v2642_v41 }
  0xee   :  { %v503_v46 = vpop.f32.mrf.mxu3  ;;  %1932 = vmatmul.msk.f32.gmra.mxu2 %vm205_vm6, %v2660_v43  ;;  %v2940_v48 = vpop.f32.mrf.mxu0 }
  0xef   :  { %3425 = vst [vmem:[#allocation21_spill] sm:$0xff] %v2940_v48  ;;  %v529_v5 = vmul.f32 %v503_v46, %v438_v49  ;;  %v2942_v44 = vpop.f32.mrf.mxu1 }
  0xf0   :  { %3426 = vst [vmem:[#allocation22_spill] sm:$0xff] %v2942_v44 }
  0xf1   :  { %v544_v6 = vadd.f32 %v543_v1, %v529_v5  ;;  %v441_v57 = vpop.f32.mrf.mxu2  ;;  %1910 = vmatmul.msk.f32.gmra.mxu0 %vm91_vm15, %v2653_v42 }
  0xf2   :  { %1962 = vmatmul.msk.f32.gmra.mxu1 %vm91_vm15, %v2653_v42 }
  0xf3   :  { %1984 = vmatmul.msk.f32.gmra.mxu3 %vm205_vm6, %v2660_v43 }
  0xf6   :  { %v506_v7 = vpop.f32.mrf.mxu3  ;;  %1933 = vmatmul.msk.f32.gmra.mxu2 %vm205_vm6, %v2690_v47  ;;  %v2952_v56 = vpop.f32.mrf.mxu0 }
  0xf7   :  { %3427 = vst [vmem:[#allocation23_spill] sm:$0xff] %v2952_v56  ;;  %v530_v49 = vmul.f32 %v506_v7, %v441_v57  ;;  %v2954_v46 = vpop.f32.mrf.mxu1 }
  0xf8   :  { %3428 = vst [vmem:[#allocation24_spill] sm:$0xff] %v2954_v46  ;;  %v2978_v46 = vperm.slane %v2291_v2, 7 }
  0xf9   :  { %v545_v1 = vadd.f32 %v544_v6, %v530_v49  ;;  %v444_v5 = vpop.f32.mrf.mxu2  ;;  %1911 = vmatmul.msk.f32.gmra.mxu0 %vm91_vm15, %v2674_v45  ;;  %v2969_v6 = vperm.slane %v2286_v0, 6  ;;  %v2972_v49 = vperm.slane %v2286_v0, 7 }
  0xfa   :  { %1963 = vmatmul.msk.f32.gmra.mxu1 %vm91_vm15, %v2674_v45  ;;  %v2975_v45 = vperm.slane %v2291_v2, 6  ;;  %vm1554_vm7 = vcmp.eq.s32.totalorder %v2305_v9, %v2978_v46  ;;  %vm1553_vm11 = vcmp.eq.s32.totalorder %v2311_v11, %v2978_v46  ;;  %vm1552_vm2 = vcmp.eq.s32.totalorder %v2314_v12, %v2978_v46 }
  0xfb   :  { %1985 = vmatmul.msk.f32.gmra.mxu3 %vm205_vm6, %v2690_v47  ;;  %vm1370_vm3 = vcmp.eq.s32.totalorder %v2302_v8, %v2969_v6  ;;  %vm1569_vm4 = vcmp.eq.s32.totalorder %v2302_v8, %v2972_v49  ;;  %2154 = vmatpush.msk.msrb.mxu1 %vm1554_vm7, %v3420_v13  ;;  %vm1369_vm8 = vcmp.eq.s32.totalorder %v2308_v10, %v2969_v6 }
  0xfc   :  { %vm1355_vm5 = vcmp.eq.s32.totalorder %v2305_v9, %v2975_v45  ;;  %2122 = vmatpush.msk.msrb.mxu2 %vm1370_vm3, %v3420_v13  ;;  %2174 = vmatpush.msk.msrb.mxu3 %vm1569_vm4, %v3420_v13  ;;  %vm1568_vm9 = vcmp.eq.s32.totalorder %v2308_v10, %v2972_v49  ;;  %vm1354_vm10 = vcmp.eq.s32.totalorder %v2311_v11, %v2975_v45 }
  0xfd   :  { %2102 = vmatpush.msk.msrb.mxu0 %vm1355_vm5, %v3420_v13  ;;  %2155 = vmatpush.msk.msrb.mxu1 %vm1553_vm11, %v3420_v13  ;;  %vm1368_vm12 = vcmp.eq.s32.totalorder %v2305_v9, %v2969_v6  ;;  %vm1567_vm13 = vcmp.eq.s32.totalorder %v2305_v9, %v2972_v49  ;;  %vm1367_vm14 = vcmp.eq.s32.totalorder %v2311_v11, %v2969_v6  ;;  %vm1751_vm11 = vcmask 1041408  }
  0xfe   :  { %v509_v44 = vpop.f32.mrf.mxu3  ;;  %1934 = vmatmul.msk.f32.gmra.mxu2 %vm205_vm6, %v2720_v51  ;;  %v2964_v48 = vpop.f32.mrf.mxu0  ;;  %2175 = vmatpush.msk.msrb.mxu3 %vm1568_vm9, %v3420_v13  ;;  %vm1566_vm0 = vcmp.eq.s32.totalorder %v2311_v11, %v2972_v49  ;;  %vm1353_vm1 = vcmp.eq.s32.totalorder %v2314_v12, %v2975_v45  ;;  %vm1366_vm3 = vcmp.eq.s32.totalorder %v2314_v12, %v2969_v6 }
  0xff   :  { %v531_v7 = vmul.f32 %v509_v44, %v444_v5  ;;  %v2966_v57 = vpop.f32.mrf.mxu1  ;;  %2123 = vmatpush.msk.msrb.mxu2 %vm1369_vm8, %v3420_v13  ;;  %2103 = vmatpush.msk.msrb.mxu0 %vm1354_vm10, %v3420_v13  ;;  %vm1565_vm4 = vcmp.eq.s32.totalorder %v2314_v12, %v2972_v49  ;;  %vm1352_vm5 = vcmp.eq.s32.totalorder %v2293_v3, %v2975_v45  ;;  %vm1749_vm10 = vcmask 1040384  }
 0x100   :  { %2176 = vmatpush.msk.msrb.mxu3 %vm1567_vm13, %v3420_v13  ;;  %2156 = vmatpush.msk.msrb.mxu1 %vm1552_vm2, %v3420_v13  ;;  %vm1551_vm7 = vcmp.eq.s32.totalorder %v2293_v3, %v2978_v46  ;;  %vm1365_vm8 = vcmp.eq.s32.totalorder %v2293_v3, %v2969_v6  ;;  %vm1564_vm9 = vcmp.eq.s32.totalorder %v2293_v3, %v2972_v49  ;;  %v3430_v49 = vld [vmem:[#allocation11_spill] sm:$0xff]  ;;  %vm1759_vm13 = vcmask 1045504  }
 0x101   :  { %v546_v56 = vadd.f32 %v545_v1, %v531_v7  ;;  %v447_v47 = vpop.f32.mrf.mxu2  ;;  %1912 = vmatmul.msk.f32.gmra.mxu0 %vm91_vm15, %v2707_v50  ;;  %2124 = vmatpush.msk.msrb.mxu2 %vm1368_vm12, %v3420_v13  ;;  %vm1753_vm12 = vcmask 1042432  }
 0x102   :  { %1964 = vmatmul.msk.f32.gmra.mxu1 %vm91_vm15, %v2707_v50  ;;  %2177 = vmatpush.msk.msrb.mxu3 %vm1566_vm0, %v3420_v13 }
 0x103   :  { %1986 = vmatmul.msk.f32.gmra.mxu3 %vm205_vm6, %v2720_v51  ;;  %2125 = vmatpush.msk.msrb.mxu2 %vm1367_vm14, %v3420_v13  ;;  %vm1761_vm14 = vcmask 1046528  }
 0x104   :  { %2104 = vmatpush.msk.msrb.mxu0 %vm1353_vm1, %v3420_v13  ;;  %2178 = vmatpush.msk.msrb.mxu3 %vm1565_vm4, %v3420_v13 }
 0x105   :  { %2126 = vmatpush.msk.msrb.mxu2 %vm1366_vm3, %v3420_v13  ;;  %2157 = vmatpush.msk.msrb.mxu1 %vm1551_vm7, %v3420_v13 }
 0x106   :  { %v512_v0 = vpop.f32.mrf.mxu3  ;;  %1935 = vmatmul.msk.f32.gmra.mxu2 %vm205_vm6, %v2738_v53  ;;  %v3000_v2 = vpop.f32.mrf.mxu0  ;;  %2105 = vmatpush.msk.msrb.mxu0 %vm1352_vm5, %v3420_v13 }
 0x107   :  { %v532_v8 = vmul.f32 %v512_v0, %v447_v47  ;;  %v3002_v44 = vpop.f32.mrf.mxu1  ;;  %2127 = vmatpush.msk.msrb.mxu2 %vm1365_vm8, %v3420_v13  ;;  %2179 = vmatpush.msk.msrb.mxu3 %vm1564_vm9, %v3420_v13  ;;  %v3431_v13 = vld [vmem:[#allocation12_spill] sm:$0xff] }
 0x109   :  { %v547_v1 = vadd.f32 %v546_v56, %v532_v8  ;;  %v450_v5 = vpop.f32.mrf.mxu2  ;;  %1913 = vmatmul.msk.f32.gmra.mxu0 %vm91_vm15, %v2731_v52 }
 0x10a   :  { %1965 = vmatmul.msk.f32.gmra.mxu1 %vm91_vm15, %v2731_v52 }
 0x10b   :  { %1987 = vmatmul.msk.f32.gmra.mxu3 %vm205_vm6, %v2738_v53 }
 0x10e   :  { %v515_v47 = vpop.f32.mrf.mxu3  ;;  %2024 = vmatmul.msk.f32.vlgmr.msra.gmra.mxu2 %vm205_vm6, %v2383_v19  ;;  %v604_v56 = vpop.f32.mrf.mxu0 }
 0x10f   :  { %v533_v7 = vmul.f32 %v515_v47, %v450_v5  ;;  %v803_v0 = vpop.f32.mrf.mxu1 }
 0x111   :  { %v3018_v8 = vadd.f32 %v547_v1, %v533_v7  ;;  %v669_v10 = vpop.f32.mrf.mxu2  ;;  %2002 = vmatmul.msk.f32.vlgmr.msra.gmra.mxu0 %vm91_vm15, %v2351_v15 }
 0x112   :  { %v717_v52 = vmul.f32 %v669_v10, %v604_v56  ;;  %2054 = vmatmul.msk.f32.vlgmr.msra.gmra.mxu1 %vm91_vm15, %v2351_v15 }
 0x113   :  { %2076 = vmatmul.msk.f32.vlgmr.msra.gmra.mxu3 %vm205_vm6, %v2383_v19 }
 0x116   :  { %v868_v53 = vpop.f32.mrf.mxu3  ;;  %2025 = vmatmul.msk.f32.gmra.mxu2 %vm205_vm6, %v2424_v21  ;;  %v607_v50 = vpop.f32.mrf.mxu0 }
 0x117   :  { %v916_v5 = vmul.f32 %v868_v53, %v803_v0  ;;  %v806_v47 = vpop.f32.mrf.mxu1 }
 0x119   :  { %v672_v1 = vpop.f32.mrf.mxu2  ;;  %2003 = vmatmul.msk.f32.gmra.mxu0 %vm91_vm15, %v2406_v20 }
 0x11a   :  { %v718_v15 = vmul.f32 %v672_v1, %v607_v50  ;;  %2055 = vmatmul.msk.f32.gmra.mxu1 %vm91_vm15, %v2406_v20 }
 0x11b   :  { %2077 = vmatmul.msk.f32.gmra.mxu3 %vm205_vm6, %v2424_v21 }
 0x11c   :  { %v733_v19 = vadd.f32 %v718_v15, %v717_v52 }
 0x11e   :  { %v871_v53 = vpop.f32.mrf.mxu3  ;;  %2026 = vmatmul.msk.f32.gmra.mxu2 %vm205_vm6, %v2450_v23  ;;  %v610_v50 = vpop.f32.mrf.mxu0 }
 0x11f   :  { %v917_v56 = vmul.f32 %v871_v53, %v806_v47  ;;  %v809_v20 = vpop.f32.mrf.mxu1 }
 0x121   :  { %v932_v7 = vadd.f32 %v917_v56, %v916_v5  ;;  %v675_v0 = vpop.f32.mrf.mxu2  ;;  %2004 = vmatmul.msk.f32.gmra.mxu0 %vm91_vm15, %v2437_v22 }
 0x122   :  { %v719_v21 = vmul.f32 %v675_v0, %v610_v50  ;;  %2056 = vmatmul.msk.f32.gmra.mxu1 %vm91_vm15, %v2437_v22 }
 0x123   :  { %2078 = vmatmul.msk.f32.gmra.mxu3 %vm205_vm6, %v2450_v23 }
 0x124   :  { %v734_v52 = vadd.f32 %v733_v19, %v719_v21 }
 0x126   :  { %v874_v10 = vpop.f32.mrf.mxu3  ;;  %2027 = vmatmul.msk.f32.gmra.mxu2 %vm205_vm6, %v2468_v25  ;;  %v613_v5 = vpop.f32.mrf.mxu0 }
 0x127   :  { %v918_v47 = vmul.f32 %v874_v10, %v809_v20  ;;  %v812_v1 = vpop.f32.mrf.mxu1 }
 0x129   :  { %v933_v15 = vadd.f32 %v932_v7, %v918_v47  ;;  %v678_v53 = vpop.f32.mrf.mxu2  ;;  %2005 = vmatmul.msk.f32.gmra.mxu0 %vm91_vm15, %v2461_v24 }
 0x12a   :  { %v720_v9 = vmul.f32 %v678_v53, %v613_v5  ;;  %2057 = vmatmul.msk.f32.gmra.mxu1 %vm91_vm15, %v2461_v24 }
 0x12b   :  { %2079 = vmatmul.msk.f32.gmra.mxu3 %vm205_vm6, %v2468_v25 }
 0x12c   :  { %v735_v22 = vadd.f32 %v734_v52, %v720_v9 }
 0x12e   :  { %v877_v23 = vpop.f32.mrf.mxu3  ;;  %2028 = vmatmul.msk.f32.gmra.mxu2 %vm205_vm6, %v2488_v27  ;;  %v616_v19 = vpop.f32.mrf.mxu0 }
 0x12f   :  { %v919_v50 = vmul.f32 %v877_v23, %v812_v1  ;;  %v815_v56 = vpop.f32.mrf.mxu1 }
 0x131   :  { %v934_v20 = vadd.f32 %v933_v15, %v919_v50  ;;  %v681_v7 = vpop.f32.mrf.mxu2  ;;  %2006 = vmatmul.msk.f32.gmra.mxu0 %vm91_vm15, %v2479_v26 }
 0x132   :  { %v721_v0 = vmul.f32 %v681_v7, %v616_v19  ;;  %2058 = vmatmul.msk.f32.gmra.mxu1 %vm91_vm15, %v2479_v26 }
 0x133   :  { %2080 = vmatmul.msk.f32.gmra.mxu3 %vm205_vm6, %v2488_v27 }
 0x134   :  { %v736_v24 = vadd.f32 %v735_v22, %v721_v0 }
 0x136   :  { %v880_v25 = vpop.f32.mrf.mxu3  ;;  %2029 = vmatmul.msk.f32.gmra.mxu2 %vm205_vm6, %v2514_v29  ;;  %v619_v21 = vpop.f32.mrf.mxu0 }
 0x137   :  { %v920_v26 = vmul.f32 %v880_v25, %v815_v56  ;;  %v818_v52 = vpop.f32.mrf.mxu1 }
 0x139   :  { %v935_v10 = vadd.f32 %v934_v20, %v920_v26  ;;  %v684_v27 = vpop.f32.mrf.mxu2  ;;  %2007 = vmatmul.msk.f32.gmra.mxu0 %vm91_vm15, %v2500_v28 }
 0x13a   :  { %v722_v11 = vmul.f32 %v684_v27, %v619_v21  ;;  %2059 = vmatmul.msk.f32.gmra.mxu1 %vm91_vm15, %v2500_v28 }
 0x13b   :  { %2081 = vmatmul.msk.f32.gmra.mxu3 %vm205_vm6, %v2514_v29 }
 0x13c   :  { %v737_v5 = vadd.f32 %v736_v24, %v722_v11 }
 0x13e   :  { %v883_v47 = vpop.f32.mrf.mxu3  ;;  %2030 = vmatmul.msk.f32.gmra.mxu2 %vm205_vm6, %v2534_v31  ;;  %v622_v1 = vpop.f32.mrf.mxu0 }
 0x13f   :  { %v921_v15 = vmul.f32 %v883_v47, %v818_v52  ;;  %v821_v53 = vpop.f32.mrf.mxu1 }
 0x141   :  { %v936_v9 = vadd.f32 %v935_v10, %v921_v15  ;;  %v687_v22 = vpop.f32.mrf.mxu2  ;;  %2008 = vmatmul.msk.f32.gmra.mxu0 %vm91_vm15, %v2527_v30 }
 0x142   :  { %v723_v28 = vmul.f32 %v687_v22, %v622_v1  ;;  %2060 = vmatmul.msk.f32.gmra.mxu1 %vm91_vm15, %v2527_v30 }
 0x143   :  { %2082 = vmatmul.msk.f32.gmra.mxu3 %vm205_vm6, %v2534_v31 }
 0x144   :  { %v738_v29 = vadd.f32 %v737_v5, %v723_v28 }
 0x146   :  { %v886_v23 = vpop.f32.mrf.mxu3  ;;  %2031 = vmatmul.msk.f32.gmra.mxu2 %vm205_vm6, %v2556_v33  ;;  %v625_v19 = vpop.f32.mrf.mxu0 }
 0x147   :  { %v922_v50 = vmul.f32 %v886_v23, %v821_v53  ;;  %v824_v56 = vpop.f32.mrf.mxu1  ;;  %v321_v53 = vmul.f32 %v2789_v4, %v2787_v63  ;;  %v3429_v63 = vld [vmem:[#allocation10_spill] sm:$0xff] }
 0x148   :  { %v323_v4 = vmul.f32 %v3429_v63, %v2814_v59 }
 0x149   :  { %v937_v20 = vadd.f32 %v936_v9, %v922_v50  ;;  %v690_v7 = vpop.f32.mrf.mxu2  ;;  %2009 = vmatmul.msk.f32.gmra.mxu0 %vm91_vm15, %v2545_v32  ;;  %v3433_v50 = vld [vmem:[#allocation14_spill] sm:$0xff] }
 0x14a   :  { %v724_v30 = vmul.f32 %v690_v7, %v625_v19  ;;  %2061 = vmatmul.msk.f32.gmra.mxu1 %vm91_vm15, %v2545_v32 }
 0x14b   :  { %2083 = vmatmul.msk.f32.gmra.mxu3 %vm205_vm6, %v2556_v33 }
 0x14c   :  { %v739_v31 = vadd.f32 %v738_v29, %v724_v30  ;;  %v324_v29 = vmul.f32 %v3431_v13, %v3430_v49  ;;  %v3434_v30 = vld [vmem:[#allocation15_spill] sm:$0xff] }
 0x14e   :  { %v889_v0 = vpop.f32.mrf.mxu3  ;;  %2032 = vmatmul.msk.f32.gmra.mxu2 %vm205_vm6, %v2576_v35  ;;  %v628_v24 = vpop.f32.mrf.mxu0 }
 0x14f   :  { %v923_v25 = vmul.f32 %v889_v0, %v824_v56  ;;  %v827_v21 = vpop.f32.mrf.mxu1 }
 0x151   :  { %v938_v12 = vadd.f32 %v937_v20, %v923_v25  ;;  %v693_v26 = vpop.f32.mrf.mxu2  ;;  %2010 = vmatmul.msk.f32.gmra.mxu0 %vm91_vm15, %v2569_v34 }
 0x152   :  { %v725_v32 = vmul.f32 %v693_v26, %v628_v24  ;;  %2062 = vmatmul.msk.f32.gmra.mxu1 %vm91_vm15, %v2569_v34 }
 0x153   :  { %2084 = vmatmul.msk.f32.gmra.mxu3 %vm205_vm6, %v2576_v35 }
 0x154   :  { %v740_v33 = vadd.f32 %v739_v31, %v725_v32  ;;  %v3435_v31 = vld [vmem:[#allocation16_spill] sm:$0xff] }
 0x155   :  { %v326_v0 = vmul.f32 %v3435_v31, %v3434_v30 }
 0x156   :  { %v892_v52 = vpop.f32.mrf.mxu3  ;;  %2033 = vmatmul.msk.f32.gmra.mxu2 %vm205_vm6, %v2598_v37  ;;  %v631_v10 = vpop.f32.mrf.mxu0 }
 0x157   :  { %v924_v27 = vmul.f32 %v892_v52, %v827_v21  ;;  %v830_v11 = vpop.f32.mrf.mxu1  ;;  %v327_v21 = vmul.f32 %v2882_v61, %v2880_v16 }
 0x159   :  { %v939_v5 = vadd.f32 %v938_v12, %v924_v27  ;;  %v696_v47 = vpop.f32.mrf.mxu2  ;;  %2011 = vmatmul.msk.f32.gmra.mxu0 %vm91_vm15, %v2587_v36  ;;  %v3436_v27 = vld [vmem:[#allocation17_spill] sm:$0xff] }
 0x15a   :  { %v726_v34 = vmul.f32 %v696_v47, %v631_v10  ;;  %2063 = vmatmul.msk.f32.gmra.mxu1 %vm91_vm15, %v2587_v36  ;;  %v320_v36 = vmul.f32 %v2768_v60, %v2766_v58 }
 0x15b   :  { %2085 = vmatmul.msk.f32.gmra.mxu3 %vm205_vm6, %v2598_v37  ;;  %v319_v37 = vmul.f32 %v2756_v55, %v2754_v54  ;;  %v322_v54 = vmul.f32 %v2804_v17, %v2802_v14  ;;  %v3432_v17 = vld [vmem:[#allocation13_spill] sm:$0xff] }
 0x15c   :  { %v741_v35 = vadd.f32 %v740_v33, %v726_v34  ;;  %v3438_v34 = vld [vmem:[#allocation19_spill] sm:$0xff] }
 0x15d   :  { %v335_v58 = vadd.f32 %v320_v36, %v319_v37  ;;  %v3441_v36 = vld [vmem:[#allocation22_spill] sm:$0xff] }
 0x15e   :  { %v895_v45 = vpop.f32.mrf.mxu3  ;;  %2034 = vmatmul.msk.f32.gmra.mxu2 %vm205_vm6, %v2624_v39  ;;  %v634_v46 = vpop.f32.mrf.mxu0  ;;  %v3442_v37 = vld [vmem:[#allocation6_spill] sm:$0xff] }
 0x15f   :  { %v925_v1 = vmul.f32 %v895_v45, %v830_v11  ;;  %v833_v15 = vpop.f32.mrf.mxu1  ;;  %v336_v60 = vadd.f32 %v335_v58, %v321_v53  ;;  %v3437_v11 = vld [vmem:[#allocation18_spill] sm:$0xff] }
 0x161   :  { %v940_v9 = vadd.f32 %v939_v5, %v925_v1  ;;  %v699_v6 = vpop.f32.mrf.mxu2  ;;  %2012 = vmatmul.msk.f32.gmra.mxu0 %vm91_vm15, %v2611_v38 }
 0x162   :  { %v727_v22 = vmul.f32 %v699_v6, %v634_v46  ;;  %2064 = vmatmul.msk.f32.gmra.mxu1 %vm91_vm15, %v2611_v38  ;;  %v337_v38 = vadd.f32 %v336_v60, %v322_v54  ;;  %v3440_v46 = vld [vmem:[#allocation21_spill] sm:$0xff]  ;;  %v3443_v6 = vld [vmem:[#allocation23_spill] sm:$0xff] }
 0x163   :  { %2086 = vmatmul.msk.f32.gmra.mxu3 %vm205_vm6, %v2624_v39  ;;  %v325_v39 = vmul.f32 %v3433_v50, %v3432_v17  ;;  %v331_v1 = vmul.f32 %v3441_v36, %v3440_v46 }
 0x164   :  { %v742_v55 = vadd.f32 %v741_v35, %v727_v22  ;;  %v338_v14 = vadd.f32 %v337_v38, %v323_v4  ;;  %v3439_v35 = vld [vmem:[#allocation20_spill] sm:$0xff]  ;;  %v3445_v4 = vld [vmem:[#allocation5_spill] sm:$0xff]  ;;  %v334_v38 = vmul.f32 %v3002_v44, %v3000_v2 }
 0x165   :  { %v330_v45 = vmul.f32 %v3439_v35, %v3438_v34  ;;  %v2199_v35 = vld [vmem:[%s3393_s2] sm:$0xff] }
 0x166   :  { %v898_v28 = vpop.f32.mrf.mxu3  ;;  %2035 = vmatmul.msk.f32.gmra.mxu2 %vm205_vm6, %v2642_v41  ;;  %v637_v3 = vpop.f32.mrf.mxu0  ;;  %v339_v7 = vadd.f32 %v338_v14, %v324_v29  ;;  %v549_v14 = vrot.slane %v3018_v8, 4 }
 0x167   :  { %v926_v23 = vmul.f32 %v898_v28, %v833_v15  ;;  %v836_v19 = vpop.f32.mrf.mxu1 }
 0x168   :  { %v340_v25 = vadd.f32 %v339_v7, %v325_v39  ;;  %v3446_v39 = vld [vmem:[#allocation7_spill] sm:$0xff]  ;;  %v3447_v7 = vld [vmem:[#allocation9_spill] sm:$0xff] }
 0x169   :  { %v941_v56 = vadd.f32 %v940_v9, %v926_v23  ;;  %v702_v20 = vpop.f32.mrf.mxu2  ;;  %2013 = vmatmul.msk.f32.gmra.mxu0 %vm91_vm15, %v2635_v40 }
 0x16a   :  { %v728_v59 = vmul.f32 %v702_v20, %v637_v3  ;;  %2065 = vmatmul.msk.f32.gmra.mxu1 %vm91_vm15, %v2635_v40  ;;  %v341_v32 = vadd.f32 %v340_v25, %v326_v0  ;;  %v328_v40 = vmul.f32 %v2894_v18, %v2892_v62  ;;  %v550_v20 = vadd.f32 %v549_v14, %v3018_v8 }
 0x16b   :  { %2087 = vmatmul.msk.f32.gmra.mxu3 %vm205_vm6, %v2642_v41  ;;  %v329_v41 = vmul.f32 %v3437_v11, %v3436_v27 }
 0x16c   :  { %v743_v24 = vadd.f32 %v742_v55, %v728_v59  ;;  %v342_v10 = vadd.f32 %v341_v32, %v327_v21  ;;  %v551_v25 = vrot.slane %v550_v20, 2 }
 0x16e   :  { %v901_v12 = vpop.f32.mrf.mxu3  ;;  %2036 = vmatmul.msk.f32.gmra.mxu2 %vm205_vm6, %v2660_v43  ;;  %v640_v26 = vpop.f32.mrf.mxu0  ;;  %v343_v16 = vadd.f32 %v342_v10, %v328_v40  ;;  %v552_v40 = vadd.f32 %v551_v25, %v550_v20  ;;  %v2198_v10 = vld [vmem:[%s3394_s3] sm:$0xff]  ;;  %v2204_v20 = vld [vmem:[%s3394_s3 + $0x18] sm:$0xff] }
 0x16f   :  { %v927_v33 = vmul.f32 %v901_v12, %v836_v19  ;;  %v839_v52 = vpop.f32.mrf.mxu1 }
 0x170   :  { %v344_v18 = vadd.f32 %v343_v16, %v329_v41 }
 0x171   :  { %v942_v5 = vadd.f32 %v941_v56, %v927_v33  ;;  %v705_v47 = vpop.f32.mrf.mxu2  ;;  %2014 = vmatmul.msk.f32.gmra.mxu0 %vm91_vm15, %v2653_v42 }
 0x172   :  { %v729_v61 = vmul.f32 %v705_v47, %v640_v26  ;;  %2066 = vmatmul.msk.f32.gmra.mxu1 %vm91_vm15, %v2653_v42  ;;  %v345_v9 = vadd.f32 %v344_v18, %v330_v45  ;;  %v3444_v42 = vld [vmem:[#allocation24_spill] sm:$0xff] }
 0x173   :  { %2088 = vmatmul.msk.f32.gmra.mxu3 %vm205_vm6, %v2660_v43  ;;  %v332_v22 = vmul.f32 %v3444_v42, %v3443_v6  ;;  %v333_v43 = vmul.f32 %v2966_v57, %v2964_v48  ;;  %v3448_v26 = vld [vmem:[#allocation8_spill] sm:$0xff] }
 0x174   :  { %v744_v62 = vadd.f32 %v743_v24, %v729_v61  ;;  %v346_v55 = vadd.f32 %v345_v9, %v331_v1  ;;  %v553_v61 = vrot.slane %v552_v40, 1  ;;  %v2200_v9 = vld [vmem:[%s3394_s3 + $0x8] sm:$0xff] }
 0x176   :  { %v904_v15 = vpop.f32.mrf.mxu3  ;;  %2037 = vmatmul.msk.f32.gmra.mxu2 %vm205_vm6, %v3442_v37  ;;  %v643_v53 = vpop.f32.mrf.mxu0  ;;  %v347_v3 = vadd.f32 %v346_v55, %v332_v22  ;;  %v554_v1 = vadd.f32 %v553_v61, %v552_v40 }
 0x177   :  { %v928_v58 = vmul.f32 %v904_v15, %v839_v52  ;;  %v842_v54 = vpop.f32.mrf.mxu1 }
 0x178   :  { %v348_v13 = vadd.f32 %v347_v3, %v333_v43 }
 0x179   :  { %v943_v60 = vadd.f32 %v942_v5, %v928_v58  ;;  %v708_v63 = vpop.f32.mrf.mxu2  ;;  %2015 = vmatmul.msk.f32.gmra.mxu0 %vm91_vm15, %v3445_v4 }
 0x17a   :  { %v730_v28 = vmul.f32 %v708_v63, %v643_v53  ;;  %2067 = vmatmul.msk.f32.gmra.mxu1 %vm91_vm15, %v3445_v4  ;;  %v349_v57 = vadd.f32 %v348_v13, %v334_v38  ;;  %v2201_v4 = vld [vmem:[%s3393_s2 + $0x8] sm:$0xff] }
 0x17b   :  { %2089 = vmatmul.msk.f32.gmra.mxu3 %vm205_vm6, %v3442_v37 }
 0x17c   :  { %v745_v49 = vadd.f32 %v744_v62, %v730_v28  ;;  %v350_v44 = vrot.slane %v349_v57, 4 }
 0x17e   :  { %v907_v29 = vpop.f32.mrf.mxu3  ;;  %2038 = vmatmul.msk.f32.gmra.mxu2 %vm205_vm6, %v2720_v51  ;;  %v646_v48 = vpop.f32.mrf.mxu0  ;;  %v351_v31 = vadd.f32 %v350_v44, %v349_v57 }
 0x17f   :  { %v929_v23 = vmul.f32 %v907_v29, %v842_v54  ;;  %v845_v19 = vpop.f32.mrf.mxu1 }
 0x181   :  { %v944_v17 = vadd.f32 %v943_v60, %v929_v23  ;;  %v711_v50 = vpop.f32.mrf.mxu2  ;;  %2016 = vmatmul.msk.f32.gmra.mxu0 %vm91_vm15, %v3446_v39 }
 0x182   :  { %v731_v2 = vmul.f32 %v711_v50, %v646_v48  ;;  %2068 = vmatmul.msk.f32.gmra.mxu1 %vm91_vm15, %v3446_v39  ;;  %v2202_v48 = vld [vmem:[%s3394_s3 + $0x10] sm:$0xff] }
 0x183   :  { %2090 = vmatmul.msk.f32.gmra.mxu3 %vm205_vm6, %v2720_v51  ;;  %v352_v51 = vrot.slane %v351_v31, 2  ;;  %v2203_v39 = vld [vmem:[%s3393_s2 + $0x10] sm:$0xff] }
 0x184   :  { %v746_v56 = vadd.f32 %v745_v49, %v731_v2 }
 0x185   :  { %v353_v11 = vadd.f32 %v352_v51, %v351_v31 }
 0x186   :  { %v910_v59 = vpop.f32.mrf.mxu3  ;;  %2039 = vmatmul.msk.f32.gmra.mxu2 %vm205_vm6, %v3447_v7  ;;  %v649_v30 = vpop.f32.mrf.mxu0 }
 0x187   :  { %v930_v0 = vmul.f32 %v910_v59, %v845_v19  ;;  %v848_v24 = vpop.f32.mrf.mxu1  ;;  %v354_v18 = vrot.slane %v353_v11, 1 }
 0x189   :  { %v945_v21 = vadd.f32 %v944_v17, %v930_v0  ;;  %v714_v12 = vpop.f32.mrf.mxu2  ;;  %2017 = vmatmul.msk.f32.gmra.mxu0 %vm91_vm15, %v3448_v26  ;;  %v355_v42 = vadd.f32 %v354_v18, %v353_v11 }
 0x18a   :  { %v732_v32 = vmul.f32 %v714_v12, %v649_v30  ;;  %2069 = vmatmul.msk.f32.gmra.mxu1 %vm91_vm15, %v3448_v26  ;;  %v2206_v26 = vld [vmem:[%s3394_s3 + $0x20] sm:$0xff] }
 0x18b   :  { %2091 = vmatmul.msk.f32.gmra.mxu3 %vm205_vm6, %v3447_v7  ;;  %v1750_v43 = vsel %vm1749_vm10, %v355_v42, %v554_v1 }
 0x18c   :  { %v747_v8 = vadd.f32 %v746_v56, %v732_v32 }
 0x18e   :  { %v748_v33 = vrot.slane %v747_v8, 4  ;;  %v913_v52 = vpop.f32.mrf.mxu3  ;;  %2128 = vmatmul.msk.f32.vlgmr.msrb.gmra.mxu2 %vm205_vm6, %v2198_v10  ;;  %v1002_v27 = vpop.f32.mrf.mxu0 }
 0x18f   :  { %v931_v41 = vmul.f32 %v913_v52, %v848_v24  ;;  %v1201_v5 = vpop.f32.mrf.mxu1  ;;  %v2205_v24 = vld [vmem:[%s3393_s2 + $0x18] sm:$0xff]  ;;  %v2207_v52 = vld [vmem:[%s3393_s2 + $0x20] sm:$0xff] }
 0x190   :  { %v749_v47 = vadd.f32 %v748_v33, %v747_v8 }
 0x191   :  { %v946_v16 = vadd.f32 %v945_v21, %v931_v41  ;;  %v1067_v34 = vpop.f32.mrf.mxu2  ;;  %2106 = vmatmul.msk.f32.vlgmr.msrb.gmra.mxu0 %vm91_vm15, %v2199_v35  ;;  %v2208_v41 = vld [vmem:[%s3394_s3 + $0x28] sm:$0xff] }
 0x192   :  { %v750_v45 = vrot.slane %v749_v47, 2  ;;  %v1115_v62 = vmul.f32 %v1067_v34, %v1002_v27  ;;  %2158 = vmatmul.msk.f32.vlgmr.msrb.gmra.mxu1 %vm91_vm15, %v2199_v35  ;;  %v2209_v35 = vld [vmem:[%s3393_s2 + $0x28] sm:$0xff] }
 0x193   :  { %v947_v46 = vrot.slane %v946_v16, 4  ;;  %2180 = vmatmul.msk.f32.vlgmr.msrb.gmra.mxu3 %vm205_vm6, %v2198_v10 }
 0x194   :  { %v751_v36 = vadd.f32 %v750_v45, %v749_v47 }
 0x195   :  { %v948_v15 = vadd.f32 %v947_v46, %v946_v16  ;;  %v2210_v46 = vld [vmem:[%s3394_s3 + $0x30] sm:$0xff] }
 0x196   :  { %v752_v37 = vrot.slane %v751_v36, 1  ;;  %v1266_v53 = vpop.f32.mrf.mxu3  ;;  %2129 = vmatmul.msk.f32.gmra.mxu2 %vm205_vm6, %v2200_v9  ;;  %v1005_v6 = vpop.f32.mrf.mxu0 }
 0x197   :  { %v949_v22 = vrot.slane %v948_v15, 2  ;;  %v1314_v58 = vmul.f32 %v1266_v53, %v1201_v5  ;;  %v1204_v54 = vpop.f32.mrf.mxu1 }
 0x198   :  { %v753_v55 = vadd.f32 %v752_v37, %v751_v36 }
 0x199   :  { %v950_v60 = vadd.f32 %v949_v22, %v948_v15  ;;  %v1070_v63 = vpop.f32.mrf.mxu2  ;;  %2107 = vmatmul.msk.f32.gmra.mxu0 %vm91_vm15, %v2201_v4 }
 0x19a   :  { %v1752_v28 = vsel %vm1751_vm11, %v1750_v43, %v753_v55  ;;  %v1116_v3 = vmul.f32 %v1070_v63, %v1005_v6  ;;  %2159 = vmatmul.msk.f32.gmra.mxu1 %vm91_vm15, %v2201_v4  ;;  %v2213_v4 = vld [vmem:[%s3393_s2 + $0x38] sm:$0xff] }
 0x19b   :  { %v951_v38 = vrot.slane %v950_v60, 1  ;;  %2181 = vmatmul.msk.f32.gmra.mxu3 %vm205_vm6, %v2200_v9  ;;  %v2211_v9 = vld [vmem:[%s3393_s2 + $0x30] sm:$0xff] }
 0x19c   :  { %v1131_v49 = vadd.f32 %v1116_v3, %v1115_v62 }
 0x19d   :  { %v952_v13 = vadd.f32 %v951_v38, %v950_v60 }
 0x19e   :  { %v1269_v29 = vpop.f32.mrf.mxu3  ;;  %2130 = vmatmul.msk.f32.gmra.mxu2 %vm205_vm6, %v2202_v48  ;;  %v1008_v57 = vpop.f32.mrf.mxu0 }
 0x19f   :  { %v1315_v23 = vmul.f32 %v1269_v29, %v1204_v54  ;;  %v1207_v19 = vpop.f32.mrf.mxu1  ;;  %v3246_v14 = vsel %vm1753_vm12, %v1752_v28, %v952_v13 }
 0x1a1   :  { %v1330_v17 = vadd.f32 %v1315_v23, %v1314_v58  ;;  %v1073_v50 = vpop.f32.mrf.mxu2  ;;  %2108 = vmatmul.msk.f32.gmra.mxu0 %vm91_vm15, %v2203_v39  ;;  %v2212_v58 = vld [vmem:[%s3394_s3 + $0x38] sm:$0xff] }
 0x1a2   :  { %v1117_v2 = vmul.f32 %v1073_v50, %v1008_v57  ;;  %2160 = vmatmul.msk.f32.gmra.mxu1 %vm91_vm15, %v2203_v39 }
 0x1a3   :  { %2182 = vmatmul.msk.f32.gmra.mxu3 %vm205_vm6, %v2202_v48 }
 0x1a4   :  { %v1132_v44 = vadd.f32 %v1131_v49, %v1117_v2  ;;  %v2214_v49 = vld [vmem:[%s3394_s3 + $0x40] sm:$0xff]  ;;  %v2216_v2 = vld [vmem:[%s3394_s3 + $0x48] sm:$0xff] }
 0x1a6   :  { %v1272_v56 = vpop.f32.mrf.mxu3  ;;  %2131 = vmatmul.msk.f32.gmra.mxu2 %vm205_vm6, %v2204_v20  ;;  %v1011_v59 = vpop.f32.mrf.mxu0 }
 0x1a7   :  { %v1316_v7 = vmul.f32 %v1272_v56, %v1207_v19  ;;  %v1210_v30 = vpop.f32.mrf.mxu1  ;;  %v2215_v19 = vld [vmem:[%s3393_s2 + $0x40] sm:$0xff] }
 0x1a9   :  { %v1331_v31 = vadd.f32 %v1330_v17, %v1316_v7  ;;  %v1076_v0 = vpop.f32.mrf.mxu2  ;;  %2109 = vmatmul.msk.f32.gmra.mxu0 %vm91_vm15, %v2205_v24 }
 0x1aa   :  { %v1118_v25 = vmul.f32 %v1076_v0, %v1011_v59  ;;  %2161 = vmatmul.msk.f32.gmra.mxu1 %vm91_vm15, %v2205_v24 }
 0x1ab   :  { %2183 = vmatmul.msk.f32.gmra.mxu3 %vm205_vm6, %v2204_v20 }
 0x1ac   :  { %v1133_v21 = vadd.f32 %v1132_v44, %v1118_v25  ;;  %v2218_v25 = vld [vmem:[%s3394_s3 + $0x50] sm:$0xff] }
 0x1ae   :  { %v1275_v12 = vpop.f32.mrf.mxu3  ;;  %2132 = vmatmul.msk.f32.gmra.mxu2 %vm205_vm6, %v2206_v26  ;;  %v1014_v32 = vpop.f32.mrf.mxu0 }
 0x1af   :  { %v1317_v51 = vmul.f32 %v1275_v12, %v1210_v30  ;;  %v1213_v8 = vpop.f32.mrf.mxu1  ;;  %v2217_v30 = vld [vmem:[%s3393_s2 + $0x48] sm:$0xff] }
 0x1b1   :  { %v1332_v40 = vadd.f32 %v1331_v31, %v1317_v51  ;;  %v1079_v33 = vpop.f32.mrf.mxu2  ;;  %2110 = vmatmul.msk.f32.gmra.mxu0 %vm91_vm15, %v2207_v52 }
 0x1b2   :  { %v1119_v10 = vmul.f32 %v1079_v33, %v1014_v32  ;;  %2162 = vmatmul.msk.f32.gmra.mxu1 %vm91_vm15, %v2207_v52 }
 0x1b3   :  { %2184 = vmatmul.msk.f32.gmra.mxu3 %vm205_vm6, %v2206_v26 }
 0x1b4   :  { %v1134_v27 = vadd.f32 %v1133_v21, %v1119_v10  ;;  %v2220_v10 = vld [vmem:[%s3394_s3 + $0x58] sm:$0xff] }
 0x1b6   :  { %v1278_v11 = vpop.f32.mrf.mxu3  ;;  %2133 = vmatmul.msk.f32.gmra.mxu2 %vm205_vm6, %v2208_v41  ;;  %v1017_v5 = vpop.f32.mrf.mxu0 }
 0x1b7   :  { %v1318_v47 = vmul.f32 %v1278_v11, %v1213_v8  ;;  %v1216_v61 = vpop.f32.mrf.mxu1  ;;  %v2219_v8 = vld [vmem:[%s3393_s2 + $0x50] sm:$0xff] }
 0x1b9   :  { %v1333_v16 = vadd.f32 %v1332_v40, %v1318_v47  ;;  %v1082_v34 = vpop.f32.mrf.mxu2  ;;  %2111 = vmatmul.msk.f32.gmra.mxu0 %vm91_vm15, %v2209_v35 }
 0x1ba   :  { %v1120_v45 = vmul.f32 %v1082_v34, %v1017_v5  ;;  %2163 = vmatmul.msk.f32.gmra.mxu1 %vm91_vm15, %v2209_v35 }
 0x1bb   :  { %2185 = vmatmul.msk.f32.gmra.mxu3 %vm205_vm6, %v2208_v41 }
 0x1bc   :  { %v1135_v62 = vadd.f32 %v1134_v27, %v1120_v45  ;;  %v2222_v45 = vld [vmem:[%s3394_s3 + $0x60] sm:$0xff] }
 0x1be   :  { %v1281_v18 = vpop.f32.mrf.mxu3  ;;  %2134 = vmatmul.msk.f32.gmra.mxu2 %vm205_vm6, %v2210_v46  ;;  %v1020_v36 = vpop.f32.mrf.mxu0 }
 0x1bf   :  { %v1319_v1 = vmul.f32 %v1281_v18, %v1216_v61  ;;  %v1219_v15 = vpop.f32.mrf.mxu1  ;;  %v2221_v61 = vld [vmem:[%s3393_s2 + $0x58] sm:$0xff] }
 0x1c1   :  { %v1334_v37 = vadd.f32 %v1333_v16, %v1319_v1  ;;  %v1085_v53 = vpop.f32.mrf.mxu2  ;;  %2112 = vmatmul.msk.f32.gmra.mxu0 %vm91_vm15, %v2211_v9 }
 0x1c2   :  { %v1121_v6 = vmul.f32 %v1085_v53, %v1020_v36  ;;  %2164 = vmatmul.msk.f32.gmra.mxu1 %vm91_vm15, %v2211_v9 }
 0x1c3   :  { %2186 = vmatmul.msk.f32.gmra.mxu3 %vm205_vm6, %v2210_v46 }
 0x1c4   :  { %v1136_v42 = vadd.f32 %v1135_v62, %v1121_v6  ;;  %v2224_v6 = vld [vmem:[%s3394_s3 + $0x68] sm:$0xff] }
 0x1c6   :  { %v1284_v22 = vpop.f32.mrf.mxu3  ;;  %2135 = vmatmul.msk.f32.gmra.mxu2 %vm205_vm6, %v2212_v58  ;;  %v1023_v54 = vpop.f32.mrf.mxu0 }
 0x1c7   :  { %v1320_v55 = vmul.f32 %v1284_v22, %v1219_v15  ;;  %v1222_v43 = vpop.f32.mrf.mxu1  ;;  %v2223_v15 = vld [vmem:[%s3393_s2 + $0x60] sm:$0xff] }
 0x1c9   :  { %v1335_v60 = vadd.f32 %v1334_v37, %v1320_v55  ;;  %v1088_v63 = vpop.f32.mrf.mxu2  ;;  %2113 = vmatmul.msk.f32.gmra.mxu0 %vm91_vm15, %v2213_v4 }
 0x1ca   :  { %v1122_v28 = vmul.f32 %v1088_v63, %v1023_v54  ;;  %2165 = vmatmul.msk.f32.gmra.mxu1 %vm91_vm15, %v2213_v4 }
 0x1cb   :  { %2187 = vmatmul.msk.f32.gmra.mxu3 %vm205_vm6, %v2212_v58 }
 0x1cc   :  { %v1137_v3 = vadd.f32 %v1136_v42, %v1122_v28  ;;  %v2226_v28 = vld [vmem:[%s3394_s3 + $0x70] sm:$0xff] }
 0x1ce   :  { %v1287_v38 = vpop.f32.mrf.mxu3  ;;  %2136 = vmatmul.msk.f32.gmra.mxu2 %vm205_vm6, %v2214_v49  ;;  %v1026_v13 = vpop.f32.mrf.mxu0 }
 0x1cf   :  { %v1321_v29 = vmul.f32 %v1287_v38, %v1222_v43  ;;  %v1225_v48 = vpop.f32.mrf.mxu1  ;;  %v2225_v43 = vld [vmem:[%s3393_s2 + $0x68] sm:$0xff] }
 0x1d1   :  { %v1336_v57 = vadd.f32 %v1335_v60, %v1321_v29  ;;  %v1091_v23 = vpop.f32.mrf.mxu2  ;;  %2114 = vmatmul.msk.f32.gmra.mxu0 %vm91_vm15, %v2215_v19 }
 0x1d2   :  { %v1123_v17 = vmul.f32 %v1091_v23, %v1026_v13  ;;  %2166 = vmatmul.msk.f32.gmra.mxu1 %vm91_vm15, %v2215_v19 }
 0x1d3   :  { %2188 = vmatmul.msk.f32.gmra.mxu3 %vm205_vm6, %v2214_v49 }
 0x1d4   :  { %v1138_v50 = vadd.f32 %v1137_v3, %v1123_v17  ;;  %v2228_v17 = vld [vmem:[%s3394_s3 + $0x78] sm:$0xff] }
 0x1d6   :  { %v1290_v39 = vpop.f32.mrf.mxu3  ;;  %2137 = vmatmul.msk.f32.gmra.mxu2 %vm205_vm6, %v2216_v2  ;;  %v1029_v44 = vpop.f32.mrf.mxu0 }
 0x1d7   :  { %v1322_v56 = vmul.f32 %v1290_v39, %v1225_v48  ;;  %v1228_v20 = vpop.f32.mrf.mxu1  ;;  %v2227_v48 = vld [vmem:[%s3393_s2 + $0x70] sm:$0xff] }
 0x1d9   :  { %v1337_v59 = vadd.f32 %v1336_v57, %v1322_v56  ;;  %v1094_v7 = vpop.f32.mrf.mxu2  ;;  %2115 = vmatmul.msk.f32.gmra.mxu0 %vm91_vm15, %v2217_v30 }
 0x1da   :  { %v1124_v31 = vmul.f32 %v1094_v7, %v1029_v44  ;;  %2167 = vmatmul.msk.f32.gmra.mxu1 %vm91_vm15, %v2217_v30 }
 0x1db   :  { %2189 = vmatmul.msk.f32.gmra.mxu3 %vm205_vm6, %v2216_v2 }
 0x1dc   :  { %v1139_v0 = vadd.f32 %v1138_v50, %v1124_v31 }
 0x1de   :  { %v1293_v24 = vpop.f32.mrf.mxu3  ;;  %2138 = vmatmul.msk.f32.gmra.mxu2 %vm205_vm6, %v2218_v25  ;;  %v1032_v21 = vpop.f32.mrf.mxu0 }
 0x1df   :  { %v1323_v12 = vmul.f32 %v1293_v24, %v1228_v20  ;;  %v1231_v26 = vpop.f32.mrf.mxu1  ;;  %v2229_v20 = vld [vmem:[%s3393_s2 + $0x78] sm:$0xff]  ;;  %s2257_s2 = smov [#allocation2]  }
 0x1e0   :  { %s1769_s3 = sshll.u32 %s2257_s2, 4  ;;  %s1770_s3 = int_to_ptr.vmem [resolvable:$true] %s1769_s3 }
 0x1e1   :  { %v1338_v32 = vadd.f32 %v1337_v59, %v1323_v12  ;;  %v1097_v51 = vpop.f32.mrf.mxu2  ;;  %2116 = vmatmul.msk.f32.gmra.mxu0 %vm91_vm15, %v2219_v8 }
 0x1e2   :  { %v1125_v40 = vmul.f32 %v1097_v51, %v1032_v21  ;;  %2168 = vmatmul.msk.f32.gmra.mxu1 %vm91_vm15, %v2219_v8 }
 0x1e3   :  { %2190 = vmatmul.msk.f32.gmra.mxu3 %vm205_vm6, %v2218_v25 }
 0x1e4   :  { %v1140_v33 = vadd.f32 %v1139_v0, %v1125_v40 }
 0x1e6   :  { %v1296_v52 = vpop.f32.mrf.mxu3  ;;  %2139 = vmatmul.msk.f32.gmra.mxu2 %vm205_vm6, %v2220_v10  ;;  %v1035_v27 = vpop.f32.mrf.mxu0 }
 0x1e7   :  { %v1324_v11 = vmul.f32 %v1296_v52, %v1231_v26  ;;  %v1234_v41 = vpop.f32.mrf.mxu1 }
 0x1e9   :  { %v1339_v5 = vadd.f32 %v1338_v32, %v1324_v11  ;;  %v1100_v47 = vpop.f32.mrf.mxu2  ;;  %2117 = vmatmul.msk.f32.gmra.mxu0 %vm91_vm15, %v2221_v61 }
 0x1ea   :  { %v1126_v16 = vmul.f32 %v1100_v47, %v1035_v27  ;;  %2169 = vmatmul.msk.f32.gmra.mxu1 %vm91_vm15, %v2221_v61 }
 0x1eb   :  { %2191 = vmatmul.msk.f32.gmra.mxu3 %vm205_vm6, %v2220_v10 }
 0x1ec   :  { %v1141_v34 = vadd.f32 %v1140_v33, %v1126_v16 }
 0x1ee   :  { %v1299_v35 = vpop.f32.mrf.mxu3  ;;  %2140 = vmatmul.msk.f32.gmra.mxu2 %vm205_vm6, %v2222_v45  ;;  %v1038_v62 = vpop.f32.mrf.mxu0 }
 0x1ef   :  { %v1325_v18 = vmul.f32 %v1299_v35, %v1234_v41  ;;  %v1237_v46 = vpop.f32.mrf.mxu1 }
 0x1f1   :  { %v1340_v36 = vadd.f32 %v1339_v5, %v1325_v18  ;;  %v1103_v1 = vpop.f32.mrf.mxu2  ;;  %2118 = vmatmul.msk.f32.gmra.mxu0 %vm91_vm15, %v2223_v15 }
 0x1f2   :  { %v1127_v37 = vmul.f32 %v1103_v1, %v1038_v62  ;;  %2170 = vmatmul.msk.f32.gmra.mxu1 %vm91_vm15, %v2223_v15 }
 0x1f3   :  { %2192 = vmatmul.msk.f32.gmra.mxu3 %vm205_vm6, %v2222_v45 }
 0x1f4   :  { %v1142_v53 = vadd.f32 %v1141_v34, %v1127_v37 }
 0x1f6   :  { %v1302_v9 = vpop.f32.mrf.mxu3  ;;  %2141 = vmatmul.msk.f32.gmra.mxu2 %vm205_vm6, %v2224_v6  ;;  %v1041_v42 = vpop.f32.mrf.mxu0 }
 0x1f7   :  { %v1326_v22 = vmul.f32 %v1302_v9, %v1237_v46  ;;  %v1240_v58 = vpop.f32.mrf.mxu1 }
 0x1f9   :  { %v1341_v54 = vadd.f32 %v1340_v36, %v1326_v22  ;;  %v1106_v55 = vpop.f32.mrf.mxu2  ;;  %2119 = vmatmul.msk.f32.gmra.mxu0 %vm91_vm15, %v2225_v43 }
 0x1fa   :  { %v1128_v60 = vmul.f32 %v1106_v55, %v1041_v42  ;;  %2171 = vmatmul.msk.f32.gmra.mxu1 %vm91_vm15, %v2225_v43 }
 0x1fb   :  { %2193 = vmatmul.msk.f32.gmra.mxu3 %vm205_vm6, %v2224_v6 }
 0x1fc   :  { %v1143_v63 = vadd.f32 %v1142_v53, %v1128_v60 }
 0x1fe   :  { %v1305_v4 = vpop.f32.mrf.mxu3  ;;  %2142 = vmatmul.msk.f32.gmra.mxu2 %vm205_vm6, %v2226_v28  ;;  %v1044_v3 = vpop.f32.mrf.mxu0 }
 0x1ff   :  { %v1327_v38 = vmul.f32 %v1305_v4, %v1240_v58  ;;  %v1243_v49 = vpop.f32.mrf.mxu1 }
 0x201   :  { %v1342_v13 = vadd.f32 %v1341_v54, %v1327_v38  ;;  %v1109_v29 = vpop.f32.mrf.mxu2  ;;  %2120 = vmatmul.msk.f32.gmra.mxu0 %vm91_vm15, %v2227_v48 }
 0x202   :  { %v1129_v57 = vmul.f32 %v1109_v29, %v1044_v3  ;;  %2172 = vmatmul.msk.f32.gmra.mxu1 %vm91_vm15, %v2227_v48 }
 0x203   :  { %2194 = vmatmul.msk.f32.gmra.mxu3 %vm205_vm6, %v2226_v28 }
 0x204   :  { %v1144_v23 = vadd.f32 %v1143_v63, %v1129_v57 }
 0x206   :  { %v1308_v19 = vpop.f32.mrf.mxu3  ;;  %2143 = vmatmul.msk.f32.gmra.mxu2 %vm205_vm6, %v2228_v17  ;;  %v1047_v50 = vpop.f32.mrf.mxu0 }
 0x207   :  { %v1328_v39 = vmul.f32 %v1308_v19, %v1243_v49  ;;  %v1246_v2 = vpop.f32.mrf.mxu1 }
 0x209   :  { %v1343_v44 = vadd.f32 %v1342_v13, %v1328_v39  ;;  %v1112_v56 = vpop.f32.mrf.mxu2  ;;  %2121 = vmatmul.msk.f32.gmra.mxu0 %vm91_vm15, %v2229_v20 }
 0x20a   :  { %v1130_v59 = vmul.f32 %v1112_v56, %v1047_v50  ;;  %2173 = vmatmul.msk.f32.gmra.mxu1 %vm91_vm15, %v2229_v20  ;;  %vm1755_vm15 = vcmask 1043456  }
 0x20b   :  { %2195 = vmatmul.msk.f32.gmra.mxu3 %vm205_vm6, %v2228_v17  ;;  %vm1757_vm6 = vcmask 1044480  }
 0x20c   :  { %v1145_v7 = vadd.f32 %v1144_v23, %v1130_v59 }
 0x20e   :  { %v1146_v30 = vrot.slane %v1145_v7, 4  ;;  %v1311_v31 = vpop.f32.mrf.mxu3  ;;  %v1400_v0 = vpop.f32.mrf.mxu0 }
 0x20f   :  { %v1329_v24 = vmul.f32 %v1311_v31, %v1246_v2  ;;  %v1599_v25 = vpop.f32.mrf.mxu1 }
 0x210   :  { %v1147_v21 = vadd.f32 %v1146_v30, %v1145_v7 }
 0x211   :  { %v1344_v12 = vadd.f32 %v1343_v44, %v1329_v24  ;;  %v1465_v26 = vpop.f32.mrf.mxu2 }
 0x212   :  { %v1148_v32 = vrot.slane %v1147_v21, 2  ;;  %v1513_v51 = vmul.f32 %v1465_v26, %v1400_v0 }
 0x213   :  { %v1345_v8 = vrot.slane %v1344_v12, 4 }
 0x214   :  { %v1149_v40 = vadd.f32 %v1148_v32, %v1147_v21 }
 0x215   :  { %v1346_v33 = vadd.f32 %v1345_v8, %v1344_v12 }
 0x216   :  { %v1150_v52 = vrot.slane %v1149_v40, 1  ;;  %v1664_v10 = vpop.f32.mrf.mxu3  ;;  %v1403_v27 = vpop.f32.mrf.mxu0 }
 0x217   :  { %v1347_v11 = vrot.slane %v1346_v33, 2  ;;  %v1712_v41 = vmul.f32 %v1664_v10, %v1599_v25  ;;  %v1602_v5 = vpop.f32.mrf.mxu1 }
 0x218   :  { %v1151_v47 = vadd.f32 %v1150_v52, %v1149_v40 }
 0x219   :  { %v1348_v61 = vadd.f32 %v1347_v11, %v1346_v33  ;;  %v1468_v16 = vpop.f32.mrf.mxu2 }
 0x21a   :  { %v1514_v34 = vmul.f32 %v1468_v16, %v1403_v27  ;;  %v1756_v35 = vsel %vm1755_vm15, %v3246_v14, %v1151_v47 }
 0x21b   :  { %v1349_v45 = vrot.slane %v1348_v61, 1 }
 0x21c   :  { %v1529_v62 = vadd.f32 %v1514_v34, %v1513_v51 }
 0x21d   :  { %v1350_v18 = vadd.f32 %v1349_v45, %v1348_v61 }
 0x21e   :  { %v1667_v46 = vpop.f32.mrf.mxu3  ;;  %v1406_v36 = vpop.f32.mrf.mxu0 }
 0x21f   :  { %v1713_v1 = vmul.f32 %v1667_v46, %v1602_v5  ;;  %v1605_v15 = vpop.f32.mrf.mxu1  ;;  %v3385_v37 = vsel %vm1757_vm6, %v1756_v35, %v1350_v18 }
 0x221   :  { %v1728_v53 = vadd.f32 %v1713_v1, %v1712_v41  ;;  %v1471_v9 = vpop.f32.mrf.mxu2 }
 0x222   :  { %v1515_v6 = vmul.f32 %v1471_v9, %v1406_v36 }
 0x224   :  { %v1530_v42 = vadd.f32 %v1529_v62, %v1515_v6 }
 0x226   :  { %v1670_v22 = vpop.f32.mrf.mxu3  ;;  %v1409_v58 = vpop.f32.mrf.mxu0 }
 0x227   :  { %v1714_v54 = vmul.f32 %v1670_v22, %v1605_v15  ;;  %v1608_v55 = vpop.f32.mrf.mxu1 }
 0x229   :  { %v1729_v43 = vadd.f32 %v1728_v53, %v1714_v54  ;;  %v1474_v14 = vpop.f32.mrf.mxu2 }
 0x22a   :  { %v1516_v60 = vmul.f32 %v1474_v14, %v1409_v58 }
 0x22c   :  { %v1531_v63 = vadd.f32 %v1530_v42, %v1516_v60 }
 0x22e   :  { %v1673_v4 = vpop.f32.mrf.mxu3  ;;  %v1412_v28 = vpop.f32.mrf.mxu0 }
 0x22f   :  { %v1715_v3 = vmul.f32 %v1673_v4, %v1608_v55  ;;  %v1611_v38 = vpop.f32.mrf.mxu1 }
 0x231   :  { %v1730_v49 = vadd.f32 %v1729_v43, %v1715_v3  ;;  %v1477_v13 = vpop.f32.mrf.mxu2 }
 0x232   :  { %v1517_v29 = vmul.f32 %v1477_v13, %v1412_v28 }
 0x234   :  { %v1532_v48 = vadd.f32 %v1531_v63, %v1517_v29 }
 0x236   :  { %v1676_v57 = vpop.f32.mrf.mxu3  ;;  %v1415_v23 = vpop.f32.mrf.mxu0 }
 0x237   :  { %v1716_v19 = vmul.f32 %v1676_v57, %v1611_v38  ;;  %v1614_v17 = vpop.f32.mrf.mxu1 }
 0x239   :  { %v1731_v50 = vadd.f32 %v1730_v49, %v1716_v19  ;;  %v1480_v39 = vpop.f32.mrf.mxu2 }
 0x23a   :  { %v1518_v34 = vmul.f32 %v1480_v39, %v1415_v23 }
 0x23c   :  { %v1533_v18 = vadd.f32 %v1532_v48, %v1518_v34 }
 0x23e   :  { %v1679_v2 = vpop.f32.mrf.mxu3  ;;  %v1418_v44 = vpop.f32.mrf.mxu0 }
 0x23f   :  { %v1617_v56 = vpop.f32.mrf.mxu1  ;;  %v1717_v1 = vmul.f32 %v1679_v2, %v1614_v17 }
 0x241   :  { %v1483_v20 = vpop.f32.mrf.mxu2  ;;  %v1732_v58 = vadd.f32 %v1731_v50, %v1717_v1 }
 0x242   :  { %v1519_v35 = vmul.f32 %v1483_v20, %v1418_v44 }
 0x244   :  { %v1534_v53 = vadd.f32 %v1533_v18, %v1519_v35 }
 0x246   :  { %v1682_v59 = vpop.f32.mrf.mxu3  ;;  %v1421_v7 = vpop.f32.mrf.mxu0 }
 0x247   :  { %v1620_v30 = vpop.f32.mrf.mxu1  ;;  %v1718_v6 = vmul.f32 %v1682_v59, %v1617_v56 }
 0x249   :  { %v1486_v31 = vpop.f32.mrf.mxu2  ;;  %v1733_v63 = vadd.f32 %v1732_v58, %v1718_v6 }
 0x24a   :  { %v1520_v46 = vmul.f32 %v1486_v31, %v1421_v7 }
 0x24c   :  { %v1535_v42 = vadd.f32 %v1534_v53, %v1520_v46 }
 0x24e   :  { %v1685_v0 = vpop.f32.mrf.mxu3  ;;  %v1424_v24 = vpop.f32.mrf.mxu0 }
 0x24f   :  { %v1623_v25 = vpop.f32.mrf.mxu1  ;;  %v1719_v54 = vmul.f32 %v1685_v0, %v1620_v30 }
 0x251   :  { %v1489_v21 = vpop.f32.mrf.mxu2  ;;  %v1734_v38 = vadd.f32 %v1733_v63, %v1719_v54 }
 0x252   :  { %v1521_v9 = vmul.f32 %v1489_v21, %v1424_v24 }
 0x254   :  { %v1536_v55 = vadd.f32 %v1535_v42, %v1521_v9 }
 0x256   :  { %v1688_v12 = vpop.f32.mrf.mxu3  ;;  %v1427_v26 = vpop.f32.mrf.mxu0 }
 0x257   :  { %v1626_v32 = vpop.f32.mrf.mxu1  ;;  %v1720_v4 = vmul.f32 %v1688_v12, %v1623_v25 }
 0x259   :  { %v1492_v51 = vpop.f32.mrf.mxu2  ;;  %v1735_v23 = vadd.f32 %v1734_v38, %v1720_v4 }
 0x25a   :  { %v1522_v22 = vmul.f32 %v1492_v51, %v1427_v26 }
 0x25c   :  { %v1537_v28 = vadd.f32 %v1536_v55, %v1522_v22 }
 0x25e   :  { %v1691_v8 = vpop.f32.mrf.mxu3  ;;  %v1430_v40 = vpop.f32.mrf.mxu0 }
 0x25f   :  { %v1629_v33 = vpop.f32.mrf.mxu1  ;;  %v1721_v49 = vmul.f32 %v1691_v8, %v1626_v32 }
 0x261   :  { %v1495_v52 = vpop.f32.mrf.mxu2  ;;  %v1736_v50 = vadd.f32 %v1735_v23, %v1721_v49 }
 0x262   :  { %v1523_v43 = vmul.f32 %v1495_v52, %v1430_v40 }
 0x264   :  { %v1538_v29 = vadd.f32 %v1537_v28, %v1523_v43 }
 0x266   :  { %v1694_v10 = vpop.f32.mrf.mxu3  ;;  %v1433_v27 = vpop.f32.mrf.mxu0 }
 0x267   :  { %v1632_v11 = vpop.f32.mrf.mxu1  ;;  %v1722_v19 = vmul.f32 %v1694_v10, %v1629_v33 }
 0x269   :  { %v1498_v41 = vpop.f32.mrf.mxu2  ;;  %v1737_v59 = vadd.f32 %v1736_v50, %v1722_v19 }
 0x26a   :  { %v1524_v3 = vmul.f32 %v1498_v41, %v1433_v27 }
 0x26c   :  { %v1539_v17 = vadd.f32 %v1538_v29, %v1524_v3 }
 0x26e   :  { %v1697_v5 = vpop.f32.mrf.mxu3  ;;  %v1436_v47 = vpop.f32.mrf.mxu0 }
 0x26f   :  { %v1635_v61 = vpop.f32.mrf.mxu1  ;;  %v1723_v2 = vmul.f32 %v1697_v5, %v1632_v11 }
 0x271   :  { %v1501_v16 = vpop.f32.mrf.mxu2  ;;  %v1738_v0 = vadd.f32 %v1737_v59, %v1723_v2 }
 0x272   :  { %v1525_v48 = vmul.f32 %v1501_v16, %v1436_v47 }
 0x274   :  { %v1540_v44 = vadd.f32 %v1539_v17, %v1525_v48 }
 0x276   :  { %v1700_v45 = vpop.f32.mrf.mxu3  ;;  %v1439_v62 = vpop.f32.mrf.mxu0 }
 0x277   :  { %v1638_v36 = vpop.f32.mrf.mxu1  ;;  %v1724_v7 = vmul.f32 %v1700_v45, %v1635_v61 }
 0x279   :  { %v1504_v15 = vpop.f32.mrf.mxu2  ;;  %v1739_v26 = vadd.f32 %v1738_v0, %v1724_v7 }
 0x27a   :  { %v1526_v39 = vmul.f32 %v1504_v15, %v1439_v62 }
 0x27c   :  { %v1541_v31 = vadd.f32 %v1540_v44, %v1526_v39 }
 0x27e   :  { %v1703_v14 = vpop.f32.mrf.mxu3  ;;  %v1442_v60 = vpop.f32.mrf.mxu0 }
 0x27f   :  { %v1641_v57 = vpop.f32.mrf.mxu1  ;;  %v1725_v24 = vmul.f32 %v1703_v14, %v1638_v36 }
 0x281   :  { %v1507_v13 = vpop.f32.mrf.mxu2  ;;  %v1740_v40 = vadd.f32 %v1739_v26, %v1725_v24 }
 0x282   :  { %v1527_v56 = vmul.f32 %v1507_v13, %v1442_v60 }
 0x284   :  { %v1542_v21 = vadd.f32 %v1541_v31, %v1527_v56 }
 0x286   :  { %v1706_v20 = vpop.f32.mrf.mxu3  ;;  %v1445_v30 = vpop.f32.mrf.mxu0 }
 0x287   :  { %v1726_v32 = vmul.f32 %v1706_v20, %v1641_v57  ;;  %v1644_v8 = vpop.f32.mrf.mxu1 }
 0x289   :  { %v1510_v25 = vpop.f32.mrf.mxu2  ;;  %v1741_v10 = vadd.f32 %v1740_v40, %v1726_v32 }
 0x28a   :  { %v1528_v12 = vmul.f32 %v1510_v25, %v1445_v30 }
 0x28c   :  { %v1543_v51 = vadd.f32 %v1542_v21, %v1528_v12 }
 0x28e   :  { %v1544_v33 = vrot.slane %v1543_v51, 4  ;;  %v1709_v52 = vpop.f32.mrf.mxu3 }
 0x28f   :  { %v1727_v27 = vmul.f32 %v1709_v52, %v1644_v8 }
 0x290   :  { %v1545_v11 = vadd.f32 %v1544_v33, %v1543_v51 }
 0x291   :  { %v1742_v41 = vadd.f32 %v1741_v10, %v1727_v27 }
 0x292   :  { %v1546_v5 = vrot.slane %v1545_v11, 2 }
 0x293   :  { %v1743_v47 = vrot.slane %v1742_v41, 4 }
 0x294   :  { %v1547_v61 = vadd.f32 %v1546_v5, %v1545_v11 }
 0x295   :  { %v1744_v16 = vadd.f32 %v1743_v47, %v1742_v41 }
 0x296   :  { %v1548_v34 = vrot.slane %v1547_v61, 1 }
 0x297   :  { %v1745_v35 = vrot.slane %v1744_v16, 2 }
 0x298   :  { %v1549_v45 = vadd.f32 %v1548_v34, %v1547_v61 }
 0x299   :  { %v1746_v62 = vadd.f32 %v1745_v35, %v1744_v16 }
 0x29a   :  { %v1760_v18 = vsel %vm1759_vm13, %v3385_v37, %v1549_v45 }
 0x29b   :  { %v1747_v46 = vrot.slane %v1746_v62, 1 }
 0x29d   :  { %v1748_v36 = vadd.f32 %v1747_v46, %v1746_v62 }
 0x29f   :  { %v1762_v1 = vsel %vm1761_vm14, %v1760_v18, %v1748_v36 }
 0x2a0   :  { %1763 = vst [vmem:[#allocation2] sm:$0xff] %v1762_v1 }
 0x2a1   :  { %1774 = dma.vmem_to_hbm [thread:$0]  %s1770_s3, 128, %s1772_s9, [#allocation3]  }
 0x2a2   :  { %2254 = dma.done.wait [#allocation3], 128  }
 0x2a3   :  { %2255 = vsyncadd [#allocation3], 4294967168 }
 0x2a4   :  { %1779 = vsyncpa [#allocation3], 1 }

</bundles_post_ra>
